<compile_context>
chip_gen: v7x
topology: tpu7x:2x2x1
jax: 0.10.0
libtpu: 0.0.40
codegen_flags: <defaults>
</compile_context>

<pallas_src>
import functools

import jax
import jax.numpy as jnp
from jax.experimental import pallas as pl
from jax.experimental.pallas import tpu as pltpu


def rnn_fc_kernel(x_ref,        # (T, Bb, I)    time-major batch-block of inputs
                  h0in_ref,     # (2, Bb, Hp)   initial hidden state (lane-padded)
                  wih0_ref,     # (I, Hp)   = pad(W_ih_l0^T)
                  whh0_ref,     # (Hp, Hp)  = pad(W_hh_l0^T)
                  wih1_ref,     # (Hp, Hp)  = pad(W_ih_l1^T)
                  whh1_ref,     # (Hp, Hp)  = pad(W_hh_l1^T)
                  b0_ref,       # (1, Hp)   = pad(b_ih_l0 + b_hh_l0)
                  b1_ref,       # (1, Hp)   = pad(b_ih_l1 + b_hh_l1)
                  wfc_ref,      # (Hp, Cp)  = pad(W_fc^T)
                  bfc_ref,      # (1, Cp)   = pad(b_fc)
                  logits_ref,   # (T, Bb, Cp)   out  (lane-dense)
                  hout_ref,     # (2, Bb, Hp)   out  (lane-dense)
                  xproj_ref,    # (T*Bb, Hp)    scratch: hoisted input projection
                  h1seq_ref):   # (T*Bb, Hp)    scratch: per-step top-layer states
    T, Bb, I = x_ref.shape
    Hp = wih0_ref.shape[1]
    Cp = wfc_ref.shape[1]

    # ---- hoisted input projection: ONE (T*Bb, I) @ (I, Hp) MXU matmul, bias added once ----
    # Leading-dim collapse (T, Bb, I) -> (T*Bb, I) is a free view (Bb is a multiple of 8
    # or equals the full batch), so no relayout happens here.
    x2 = x_ref[...].reshape(T * Bb, I)
    xproj_ref[...] = (jnp.dot(x2, wih0_ref[...], preferred_element_type=jnp.float32)
                      + b0_ref[...])

    # Pre-broadcast layer-1 bias once (JAX does not CSE broadcast_in_dim per step).
    b1 = jnp.broadcast_to(b1_ref[...], (Bb, Hp))

    h0 = h0in_ref[0]
    h1 = h0in_ref[1]

    # ---- serial recurrence, fully unrolled (T small & static, all offsets static) ----
    for t in range(T):
        xp_t = xproj_ref[pl.ds(t * Bb, Bb), :]                     # contiguous, tile-aligned
        h0 = jnp.tanh(xp_t
                      + jnp.dot(h0, whh0_ref[...], preferred_element_type=jnp.float32))
        h1 = jnp.tanh(jnp.dot(h0, wih1_ref[...], preferred_element_type=jnp.float32)
                      + jnp.dot(h1, whh1_ref[...], preferred_element_type=jnp.float32)
                      + b1)
        h1seq_ref[pl.ds(t * Bb, Bb), :] = h1                       # contiguous, lane-dense

    hout_ref[0] = h0
    hout_ref[1] = h1

    # ---- deferred FC head: single (T*Bb, Hp) @ (Hp, Cp) matmul off the scratch ----
    logits = (jnp.dot(h1seq_ref[...], wfc_ref[...], preferred_element_type=jnp.float32)
              + bfc_ref[...])
    logits_ref[...] = logits.reshape(T, Bb, Cp)                    # free leading-dim split


@functools.partial(jax.jit, static_argnames=("batch_block",))
def rnn_model_forward(x, h, params, batch_block=None):
    """x: (B, T, I) f32 (batch_first), h: (2, B, H) f32.
    Returns (logits (B*T, C) with row = b*T + t, h_out (2, B, H))."""
    B, T, I = x.shape
    L, _, H = h.shape
    Hp = params["wih0_p"].shape[1]
    Cp = params["wfc_p"].shape[1]
    C = params["wfc_t"].shape[1]

    # Batch block: default = whole batch (grid=(1,)) — best for single-TC v5e/v6e at these
    # sizes. On v7x pass batch_block=B//2 (multiple of 8) to shard across both TensorCores.
    Bb = B if batch_block is None else batch_block
    assert B % Bb == 0 and (Bb == B or Bb % 8 == 0)
    grid = (B // Bb,)

    x_tm = jnp.transpose(x, (1, 0, 2))                              # (T, B, I) time-major
    h_p = jnp.pad(h, ((0, 0), (0, 0), (0, Hp - H)))                 # (L, B, Hp)

    logits_tm, hout_p = pl.pallas_call(
        rnn_fc_kernel,
        out_shape=(jax.ShapeDtypeStruct((T, B, Cp), jnp.float32),
                   jax.ShapeDtypeStruct((L, B, Hp), jnp.float32)),
        grid=grid,
        in_specs=[
            pl.BlockSpec((T, Bb, I), lambda i: (0, i, 0)),          # x (streamed per block)
            pl.BlockSpec((L, Bb, Hp), lambda i: (0, i, 0)),         # initial hidden
            pl.BlockSpec((I, Hp), lambda i: (0, 0)),                # W_ih_l0^T
            pl.BlockSpec((Hp, Hp), lambda i: (0, 0)),               # W_hh_l0^T
            pl.BlockSpec((Hp, Hp), lambda i: (0, 0)),               # W_ih_l1^T
            pl.BlockSpec((Hp, Hp), lambda i: (0, 0)),               # W_hh_l1^T
            pl.BlockSpec((1, Hp), lambda i: (0, 0)),                # b0
            pl.BlockSpec((1, Hp), lambda i: (0, 0)),                # b1
            pl.BlockSpec((Hp, Cp), lambda i: (0, 0)),               # W_fc^T
            pl.BlockSpec((1, Cp), lambda i: (0, 0)),                # b_fc
        ],
        out_specs=(
            pl.BlockSpec((T, Bb, Cp), lambda i: (0, i, 0)),         # logits (lane-dense)
            pl.BlockSpec((L, Bb, Hp), lambda i: (0, i, 0)),         # final hidden
        ),
        scratch_shapes=[
            pltpu.VMEM((T * Bb, Hp), jnp.float32),                  # xproj slab
            pltpu.VMEM((T * Bb, Hp), jnp.float32),                  # h1 sequence slab
        ],
        compiler_params=pltpu.CompilerParams(
            dimension_semantics=("parallel",),
            vmem_limit_bytes=32 * 1024 * 1024),
    )(x_tm, h_p,
      params["wih0_p"], params["whh0_p"], params["wih1_p"], params["whh1_p"],
      params["b0_p"], params["b1_p"], params["wfc_p"], params["bfc_p"])

    # Time-major -> PyTorch row order (b*T + t), then drop the lane padding.
    logits = jnp.transpose(logits_tm, (1, 0, 2)).reshape(B * T, Cp)[:, :C]
    h_out = hout_p[:, :, :H]
    return logits, h_out


def _pad2(a, rows, cols):
    return jnp.pad(a, ((0, rows - a.shape[0]), (0, cols - a.shape[1])))


def init_params(key, input_size, hidden_size, num_classes):
    """Deterministic init matching PyTorch RNN/Linear shapes (uniform +-1/sqrt(H)).
    Stores both exact (for the JAX reference) and lane-padded (for the kernel) weights."""
    ks = jax.random.split(key, 10)
    bound = 1.0 / jnp.sqrt(hidden_size)

    def u(k, shape):
        return jax.random.uniform(k, shape, jnp.float32, -bound, bound)

    # PyTorch: weight_ih_l0 (H, I), weight_hh_l* (H, H), biases (H,), fc (C, H)/(C,)
    w_ih0 = u(ks[0], (hidden_size, input_size))
    w_hh0 = u(ks[1], (hidden_size, hidden_size))
    b_ih0 = u(ks[2], (hidden_size,))
    b_hh0 = u(ks[3], (hidden_size,))
    w_ih1 = u(ks[4], (hidden_size, hidden_size))
    w_hh1 = u(ks[5], (hidden_size, hidden_size))
    b_ih1 = u(ks[6], (hidden_size,))
    b_hh1 = u(ks[7], (hidden_size,))
    w_fc = u(ks[8], (num_classes, hidden_size))
    b_fc = u(ks[9], (num_classes,))

    H, I, C = hidden_size, input_size, num_classes
    Hp = max(128, ((H + 127) // 128) * 128)      # lane-pad hidden width
    Cp = max(128, ((C + 127) // 128) * 128)      # lane-pad classifier width

    params = {
        # exact (reference) weights
        "wih0_t": w_ih0.T,                       # (I, H)
        "whh0_t": w_hh0.T,                       # (H, H)
        "wih1_t": w_ih1.T,                       # (H, H)
        "whh1_t": w_hh1.T,                       # (H, H)
        "b0": (b_ih0 + b_hh0)[None, :],          # (1, H)
        "b1": (b_ih1 + b_hh1)[None, :],          # (1, H)
        "wfc_t": w_fc.T,                         # (H, C)
        "bfc": b_fc[None, :],                    # (1, C)
        # lane-padded kernel weights (zero padding is numerically exact)
        "wih0_p": _pad2(w_ih0.T, I, Hp),         # (I, Hp)
        "whh0_p": _pad2(w_hh0.T, Hp, Hp),        # (Hp, Hp)
        "wih1_p": _pad2(w_ih1.T, Hp, Hp),        # (Hp, Hp)
        "whh1_p": _pad2(w_hh1.T, Hp, Hp),        # (Hp, Hp)
        "b0_p": _pad2((b_ih0 + b_hh0)[None, :], 1, Hp),   # (1, Hp)
        "b1_p": _pad2((b_ih1 + b_hh1)[None, :], 1, Hp),   # (1, Hp)
        "wfc_p": _pad2(w_fc.T, Hp, Cp),          # (Hp, Cp)
        "bfc_p": _pad2(b_fc[None, :], 1, Cp),    # (1, Cp)
    }
    return params


def reference_forward(x, h, params):
    """Pure-JAX reference of the same forward pass (for correctness check)."""
    B, T, I = x.shape
    h0, h1 = h[0], h[1]
    outs = []
    for t in range(T):
        x_t = x[:, t, :]
        h0 = jnp.tanh(x_t @ params["wih0_t"] + h0 @ params["whh0_t"] + params["b0"])
        h1 = jnp.tanh(h0 @ params["wih1_t"] + h1 @ params["whh1_t"] + params["b1"])
        outs.append(h1)
    out = jnp.stack(outs, axis=1)                 # (B, T, H)
    C = params["wfc_t"].shape[1]
    logits = out.reshape(B * T, -1) @ params["wfc_t"] + params["bfc"]
    return logits.reshape(B * T, C), jnp.stack([h0, h1], axis=0)


if __name__ == "__main__":
    # Small shapes consistent with the module: 2-layer tanh RNN (hidden=64) + fc head.
    B, T = 16, 8
    input_size = 28        # stands in for len(chars)
    hidden_size = 64
    num_layers = 2
    num_classes = input_size

    key = jax.random.PRNGKey(0)
    k_x, k_p = jax.random.split(key)

    x = jax.random.normal(k_x, (B, T, input_size), jnp.float32)
    h = jnp.zeros((num_layers, B, hidden_size), jnp.float32)  # init_hidden
    params = init_params(k_p, input_size, hidden_size, num_classes)

    logits, h_out = rnn_model_forward(x, h, params)
    jax.block_until_ready((logits, h_out))

    ref_logits, ref_h = reference_forward(x, h, params)
    assert logits.shape == (B * T, num_classes)
    assert h_out.shape == (num_layers, B, hidden_size)
    assert jnp.allclose(logits, ref_logits, atol=1e-5, rtol=1e-5)
    assert jnp.allclose(h_out, ref_h, atol=1e-5, rtol=1e-5)

    print("KERNEL_OK")
</pallas_src>

<mosaic_0001>
module attributes {stable_mosaic.version = 11 : i64} {
  func.func @rnn_fc_kernel(%arg0: i32, %arg1: memref<8x16x28xf32, #tpu.memory_space<vmem>>, %arg2: memref<2x16x128xf32, #tpu.memory_space<vmem>>, %arg3: memref<28x128xf32, #tpu.memory_space<vmem>>, %arg4: memref<128x128xf32, #tpu.memory_space<vmem>>, %arg5: memref<128x128xf32, #tpu.memory_space<vmem>>, %arg6: memref<128x128xf32, #tpu.memory_space<vmem>>, %arg7: memref<1x128xf32, #tpu.memory_space<vmem>>, %arg8: memref<1x128xf32, #tpu.memory_space<vmem>>, %arg9: memref<128x128xf32, #tpu.memory_space<vmem>>, %arg10: memref<1x128xf32, #tpu.memory_space<vmem>>, %arg11: memref<8x16x128xf32, #tpu.memory_space<vmem>>, %arg12: memref<2x16x128xf32, #tpu.memory_space<vmem>>, %arg13: memref<128x128xf32, #tpu.memory_space<vmem>>, %arg14: memref<128x128xf32, #tpu.memory_space<vmem>>) attributes {dimension_semantics = [#tpu.dimension_semantics<parallel>], iteration_bounds = array<i64: 1>, scalar_prefetch = 0 : i64, scratch_operands = 2 : i64, tpu.core_type = #tpu.core_type<tc>, window_params = [{transform_indices = @transform_0, window_bounds = array<i64: 8, 16, 28>}, {transform_indices = @transform_1, window_bounds = array<i64: 2, 16, 128>}, {pipeline_mode = #tpu.pipeline_mode<synchronous>, transform_indices = @transform_2, window_bounds = array<i64: 28, 128>}, {pipeline_mode = #tpu.pipeline_mode<synchronous>, transform_indices = @transform_3, window_bounds = array<i64: 128, 128>}, {pipeline_mode = #tpu.pipeline_mode<synchronous>, transform_indices = @transform_4, window_bounds = array<i64: 128, 128>}, {pipeline_mode = #tpu.pipeline_mode<synchronous>, transform_indices = @transform_5, window_bounds = array<i64: 128, 128>}, {pipeline_mode = #tpu.pipeline_mode<synchronous>, transform_indices = @transform_6, window_bounds = array<i64: 1, 128>}, {pipeline_mode = #tpu.pipeline_mode<synchronous>, transform_indices = @transform_7, window_bounds = array<i64: 1, 128>}, {pipeline_mode = #tpu.pipeline_mode<synchronous>, transform_indices = @transform_8, window_bounds = array<i64: 128, 128>}, {pipeline_mode = #tpu.pipeline_mode<synchronous>, transform_indices = @transform_9, window_bounds = array<i64: 1, 128>}, {transform_indices = @transform_10, window_bounds = array<i64: 8, 16, 128>}, {transform_indices = @transform_11, window_bounds = array<i64: 2, 16, 128>}]} {
    %c0 = arith.constant 0 : index
    %c0_0 = arith.constant 0 : index
    %c0_1 = arith.constant 0 : index
    %0 = vector.load %arg1[%c0, %c0_0, %c0_1] : memref<8x16x28xf32, #tpu.memory_space<vmem>>, vector<8x16x28xf32>
    %1 = vector.shape_cast %0 : vector<8x16x28xf32> to vector<128x28xf32>
    %c0_2 = arith.constant 0 : index
    %c0_3 = arith.constant 0 : index
    %2 = vector.load %arg3[%c0_2, %c0_3] : memref<28x128xf32, #tpu.memory_space<vmem>>, vector<28x128xf32>
    %cst = arith.constant dense<0.000000e+00> : vector<128x128xf32>
    %3 = tpu.matmul %1, %2, %cst {dimension_numbers = #tpu.dot_dimension_numbers<[1], [0], [0], [1], [0, 0, 1, 1], [], []>} : vector<128x28xf32>, vector<28x128xf32>, vector<128x128xf32> -> vector<128x128xf32>
    %c0_4 = arith.constant 0 : index
    %c0_5 = arith.constant 0 : index
    %4 = vector.load %arg7[%c0_4, %c0_5] : memref<1x128xf32, #tpu.memory_space<vmem>>, vector<1x128xf32>
    %5 = vector.broadcast %4 : vector<1x128xf32> to vector<128x128xf32>
    %6 = arith.addf %3, %5 : vector<128x128xf32>
    %c0_6 = arith.constant 0 : index
    %c0_7 = arith.constant 0 : index
    %7 = vector.load %arg13[%c0_6, %c0_7] : memref<128x128xf32, #tpu.memory_space<vmem>>, vector<128x128xf32>
    tpu.vector_store %arg13[%c0_6, %c0_7], %6 {strides = array<i32>} : memref<128x128xf32, #tpu.memory_space<vmem>>, vector<128x128xf32>,
    %c0_8 = arith.constant 0 : index
    %c0_9 = arith.constant 0 : index
    %8 = vector.load %arg8[%c0_8, %c0_9] : memref<1x128xf32, #tpu.memory_space<vmem>>, vector<1x128xf32>
    %9 = vector.shape_cast %8 : vector<1x128xf32> to vector<1x128xf32>
    %10 = vector.broadcast %9 : vector<1x128xf32> to vector<16x128xf32>
    %c0_10 = arith.constant 0 : index
    %c0_11 = arith.constant 0 : index
    %c0_12 = arith.constant 0 : index
    %11 = vector.load %arg2[%c0_10, %c0_11, %c0_12] : memref<2x16x128xf32, #tpu.memory_space<vmem>>, vector<1x16x128xf32>
    %12 = vector.shape_cast %11 : vector<1x16x128xf32> to vector<16x128xf32>
    %c1 = arith.constant 1 : index
    %c0_13 = arith.constant 0 : index
    %c0_14 = arith.constant 0 : index
    %13 = vector.load %arg2[%c1, %c0_13, %c0_14] : memref<2x16x128xf32, #tpu.memory_space<vmem>>, vector<1x16x128xf32>
    %14 = vector.shape_cast %13 : vector<1x16x128xf32> to vector<16x128xf32>
    %c0_15 = arith.constant 0 : index
    %c0_16 = arith.constant 0 : index
    %15 = vector.load %arg13[%c0_15, %c0_16] : memref<128x128xf32, #tpu.memory_space<vmem>>, vector<16x128xf32>
    %c0_17 = arith.constant 0 : index
    %c0_18 = arith.constant 0 : index
    %16 = vector.load %arg4[%c0_17, %c0_18] : memref<128x128xf32, #tpu.memory_space<vmem>>, vector<128x128xf32>
    %cst_19 = arith.constant dense<0.000000e+00> : vector<16x128xf32>
    %17 = tpu.matmul %12, %16, %cst_19 {dimension_numbers = #tpu.dot_dimension_numbers<[1], [0], [0], [1], [0, 0, 1, 1], [], []>} : vector<16x128xf32>, vector<128x128xf32>, vector<16x128xf32> -> vector<16x128xf32>
    %18 = arith.addf %15, %17 : vector<16x128xf32>
    %19 = math.tanh %18 : vector<16x128xf32>
    %c0_20 = arith.constant 0 : index
    %c0_21 = arith.constant 0 : index
    %20 = vector.load %arg5[%c0_20, %c0_21] : memref<128x128xf32, #tpu.memory_space<vmem>>, vector<128x128xf32>
    %cst_22 = arith.constant dense<0.000000e+00> : vector<16x128xf32>
    %21 = tpu.matmul %19, %20, %cst_22 {dimension_numbers = #tpu.dot_dimension_numbers<[1], [0], [0], [1], [0, 0, 1, 1], [], []>} : vector<16x128xf32>, vector<128x128xf32>, vector<16x128xf32> -> vector<16x128xf32>
    %c0_23 = arith.constant 0 : index
    %c0_24 = arith.constant 0 : index
    %22 = vector.load %arg6[%c0_23, %c0_24] : memref<128x128xf32, #tpu.memory_space<vmem>>, vector<128x128xf32>
    %cst_25 = arith.constant dense<0.000000e+00> : vector<16x128xf32>
    %23 = tpu.matmul %14, %22, %cst_25 {dimension_numbers = #tpu.dot_dimension_numbers<[1], [0], [0], [1], [0, 0, 1, 1], [], []>} : vector<16x128xf32>, vector<128x128xf32>, vector<16x128xf32> -> vector<16x128xf32>
    %24 = arith.addf %21, %23 : vector<16x128xf32>
    %25 = arith.addf %24, %10 : vector<16x128xf32>
    %26 = math.tanh %25 : vector<16x128xf32>
    %c0_26 = arith.constant 0 : index
    %c0_27 = arith.constant 0 : index
    %27 = vector.load %arg14[%c0_26, %c0_27] : memref<128x128xf32, #tpu.memory_space<vmem>>, vector<16x128xf32>
    tpu.vector_store %arg14[%c0_26, %c0_27], %26 {strides = array<i32>} : memref<128x128xf32, #tpu.memory_space<vmem>>, vector<16x128xf32>,
    %c16 = arith.constant 16 : index
    %c0_28 = arith.constant 0 : index
    %28 = vector.load %arg13[%c16, %c0_28] : memref<128x128xf32, #tpu.memory_space<vmem>>, vector<16x128xf32>
    %c0_29 = arith.constant 0 : index
    %c0_30 = arith.constant 0 : index
    %29 = vector.load %arg4[%c0_29, %c0_30] : memref<128x128xf32, #tpu.memory_space<vmem>>, vector<128x128xf32>
    %cst_31 = arith.constant dense<0.000000e+00> : vector<16x128xf32>
    %30 = tpu.matmul %19, %29, %cst_31 {dimension_numbers = #tpu.dot_dimension_numbers<[1], [0], [0], [1], [0, 0, 1, 1], [], []>} : vector<16x128xf32>, vector<128x128xf32>, vector<16x128xf32> -> vector<16x128xf32>
    %31 = arith.addf %28, %30 : vector<16x128xf32>
    %32 = math.tanh %31 : vector<16x128xf32>
    %c0_32 = arith.constant 0 : index
    %c0_33 = arith.constant 0 : index
    %33 = vector.load %arg5[%c0_32, %c0_33] : memref<128x128xf32, #tpu.memory_space<vmem>>, vector<128x128xf32>
    %cst_34 = arith.constant dense<0.000000e+00> : vector<16x128xf32>
    %34 = tpu.matmul %32, %33, %cst_34 {dimension_numbers = #tpu.dot_dimension_numbers<[1], [0], [0], [1], [0, 0, 1, 1], [], []>} : vector<16x128xf32>, vector<128x128xf32>, vector<16x128xf32> -> vector<16x128xf32>
    %c0_35 = arith.constant 0 : index
    %c0_36 = arith.constant 0 : index
    %35 = vector.load %arg6[%c0_35, %c0_36] : memref<128x128xf32, #tpu.memory_space<vmem>>, vector<128x128xf32>
    %cst_37 = arith.constant dense<0.000000e+00> : vector<16x128xf32>
    %36 = tpu.matmul %26, %35, %cst_37 {dimension_numbers = #tpu.dot_dimension_numbers<[1], [0], [0], [1], [0, 0, 1, 1], [], []>} : vector<16x128xf32>, vector<128x128xf32>, vector<16x128xf32> -> vector<16x128xf32>
    %37 = arith.addf %34, %36 : vector<16x128xf32>
    %38 = arith.addf %37, %10 : vector<16x128xf32>
    %39 = math.tanh %38 : vector<16x128xf32>
    %c16_38 = arith.constant 16 : index
    %c0_39 = arith.constant 0 : index
    %40 = vector.load %arg14[%c16_38, %c0_39] : memref<128x128xf32, #tpu.memory_space<vmem>>, vector<16x128xf32>
    tpu.vector_store %arg14[%c16_38, %c0_39], %39 {strides = array<i32>} : memref<128x128xf32, #tpu.memory_space<vmem>>, vector<16x128xf32>,
    %c32 = arith.constant 32 : index
    %c0_40 = arith.constant 0 : index
    %41 = vector.load %arg13[%c32, %c0_40] : memref<128x128xf32, #tpu.memory_space<vmem>>, vector<16x128xf32>
    %c0_41 = arith.constant 0 : index
    %c0_42 = arith.constant 0 : index
    %42 = vector.load %arg4[%c0_41, %c0_42] : memref<128x128xf32, #tpu.memory_space<vmem>>, vector<128x128xf32>
    %cst_43 = arith.constant dense<0.000000e+00> : vector<16x128xf32>
    %43 = tpu.matmul %32, %42, %cst_43 {dimension_numbers = #tpu.dot_dimension_numbers<[1], [0], [0], [1], [0, 0, 1, 1], [], []>} : vector<16x128xf32>, vector<128x128xf32>, vector<16x128xf32> -> vector<16x128xf32>
    %44 = arith.addf %41, %43 : vector<16x128xf32>
    %45 = math.tanh %44 : vector<16x128xf32>
    %c0_44 = arith.constant 0 : index
    %c0_45 = arith.constant 0 : index
    %46 = vector.load %arg5[%c0_44, %c0_45] : memref<128x128xf32, #tpu.memory_space<vmem>>, vector<128x128xf32>
    %cst_46 = arith.constant dense<0.000000e+00> : vector<16x128xf32>
    %47 = tpu.matmul %45, %46, %cst_46 {dimension_numbers = #tpu.dot_dimension_numbers<[1], [0], [0], [1], [0, 0, 1, 1], [], []>} : vector<16x128xf32>, vector<128x128xf32>, vector<16x128xf32> -> vector<16x128xf32>
    %c0_47 = arith.constant 0 : index
    %c0_48 = arith.constant 0 : index
    %48 = vector.load %arg6[%c0_47, %c0_48] : memref<128x128xf32, #tpu.memory_space<vmem>>, vector<128x128xf32>
    %cst_49 = arith.constant dense<0.000000e+00> : vector<16x128xf32>
    %49 = tpu.matmul %39, %48, %cst_49 {dimension_numbers = #tpu.dot_dimension_numbers<[1], [0], [0], [1], [0, 0, 1, 1], [], []>} : vector<16x128xf32>, vector<128x128xf32>, vector<16x128xf32> -> vector<16x128xf32>
    %50 = arith.addf %47, %49 : vector<16x128xf32>
    %51 = arith.addf %50, %10 : vector<16x128xf32>
    %52 = math.tanh %51 : vector<16x128xf32>
    %c32_50 = arith.constant 32 : index
    %c0_51 = arith.constant 0 : index
    %53 = vector.load %arg14[%c32_50, %c0_51] : memref<128x128xf32, #tpu.memory_space<vmem>>, vector<16x128xf32>
    tpu.vector_store %arg14[%c32_50, %c0_51], %52 {strides = array<i32>} : memref<128x128xf32, #tpu.memory_space<vmem>>, vector<16x128xf32>,
    %c48 = arith.constant 48 : index
    %c0_52 = arith.constant 0 : index
    %54 = vector.load %arg13[%c48, %c0_52] : memref<128x128xf32, #tpu.memory_space<vmem>>, vector<16x128xf32>
    %c0_53 = arith.constant 0 : index
    %c0_54 = arith.constant 0 : index
    %55 = vector.load %arg4[%c0_53, %c0_54] : memref<128x128xf32, #tpu.memory_space<vmem>>, vector<128x128xf32>
    %cst_55 = arith.constant dense<0.000000e+00> : vector<16x128xf32>
    %56 = tpu.matmul %45, %55, %cst_55 {dimension_numbers = #tpu.dot_dimension_numbers<[1], [0], [0], [1], [0, 0, 1, 1], [], []>} : vector<16x128xf32>, vector<128x128xf32>, vector<16x128xf32> -> vector<16x128xf32>
    %57 = arith.addf %54, %56 : vector<16x128xf32>
    %58 = math.tanh %57 : vector<16x128xf32>
    %c0_56 = arith.constant 0 : index
    %c0_57 = arith.constant 0 : index
    %59 = vector.load %arg5[%c0_56, %c0_57] : memref<128x128xf32, #tpu.memory_space<vmem>>, vector<128x128xf32>
    %cst_58 = arith.constant dense<0.000000e+00> : vector<16x128xf32>
    %60 = tpu.matmul %58, %59, %cst_58 {dimension_numbers = #tpu.dot_dimension_numbers<[1], [0], [0], [1], [0, 0, 1, 1], [], []>} : vector<16x128xf32>, vector<128x128xf32>, vector<16x128xf32> -> vector<16x128xf32>
    %c0_59 = arith.constant 0 : index
    %c0_60 = arith.constant 0 : index
    %61 = vector.load %arg6[%c0_59, %c0_60] : memref<128x128xf32, #tpu.memory_space<vmem>>, vector<128x128xf32>
    %cst_61 = arith.constant dense<0.000000e+00> : vector<16x128xf32>
    %62 = tpu.matmul %52, %61, %cst_61 {dimension_numbers = #tpu.dot_dimension_numbers<[1], [0], [0], [1], [0, 0, 1, 1], [], []>} : vector<16x128xf32>, vector<128x128xf32>, vector<16x128xf32> -> vector<16x128xf32>
    %63 = arith.addf %60, %62 : vector<16x128xf32>
    %64 = arith.addf %63, %10 : vector<16x128xf32>
    %65 = math.tanh %64 : vector<16x128xf32>
    %c48_62 = arith.constant 48 : index
    %c0_63 = arith.constant 0 : index
    %66 = vector.load %arg14[%c48_62, %c0_63] : memref<128x128xf32, #tpu.memory_space<vmem>>, vector<16x128xf32>
    tpu.vector_store %arg14[%c48_62, %c0_63], %65 {strides = array<i32>} : memref<128x128xf32, #tpu.memory_space<vmem>>, vector<16x128xf32>,
    %c64 = arith.constant 64 : index
    %c0_64 = arith.constant 0 : index
    %67 = vector.load %arg13[%c64, %c0_64] : memref<128x128xf32, #tpu.memory_space<vmem>>, vector<16x128xf32>
    %c0_65 = arith.constant 0 : index
    %c0_66 = arith.constant 0 : index
    %68 = vector.load %arg4[%c0_65, %c0_66] : memref<128x128xf32, #tpu.memory_space<vmem>>, vector<128x128xf32>
    %cst_67 = arith.constant dense<0.000000e+00> : vector<16x128xf32>
    %69 = tpu.matmul %58, %68, %cst_67 {dimension_numbers = #tpu.dot_dimension_numbers<[1], [0], [0], [1], [0, 0, 1, 1], [], []>} : vector<16x128xf32>, vector<128x128xf32>, vector<16x128xf32> -> vector<16x128xf32>
    %70 = arith.addf %67, %69 : vector<16x128xf32>
    %71 = math.tanh %70 : vector<16x128xf32>
    %c0_68 = arith.constant 0 : index
    %c0_69 = arith.constant 0 : index
    %72 = vector.load %arg5[%c0_68, %c0_69] : memref<128x128xf32, #tpu.memory_space<vmem>>, vector<128x128xf32>
    %cst_70 = arith.constant dense<0.000000e+00> : vector<16x128xf32>
    %73 = tpu.matmul %71, %72, %cst_70 {dimension_numbers = #tpu.dot_dimension_numbers<[1], [0], [0], [1], [0, 0, 1, 1], [], []>} : vector<16x128xf32>, vector<128x128xf32>, vector<16x128xf32> -> vector<16x128xf32>
    %c0_71 = arith.constant 0 : index
    %c0_72 = arith.constant 0 : index
    %74 = vector.load %arg6[%c0_71, %c0_72] : memref<128x128xf32, #tpu.memory_space<vmem>>, vector<128x128xf32>
    %cst_73 = arith.constant dense<0.000000e+00> : vector<16x128xf32>
    %75 = tpu.matmul %65, %74, %cst_73 {dimension_numbers = #tpu.dot_dimension_numbers<[1], [0], [0], [1], [0, 0, 1, 1], [], []>} : vector<16x128xf32>, vector<128x128xf32>, vector<16x128xf32> -> vector<16x128xf32>
    %76 = arith.addf %73, %75 : vector<16x128xf32>
    %77 = arith.addf %76, %10 : vector<16x128xf32>
    %78 = math.tanh %77 : vector<16x128xf32>
    %c64_74 = arith.constant 64 : index
    %c0_75 = arith.constant 0 : index
    %79 = vector.load %arg14[%c64_74, %c0_75] : memref<128x128xf32, #tpu.memory_space<vmem>>, vector<16x128xf32>
    tpu.vector_store %arg14[%c64_74, %c0_75], %78 {strides = array<i32>} : memref<128x128xf32, #tpu.memory_space<vmem>>, vector<16x128xf32>,
    %c80 = arith.constant 80 : index
    %c0_76 = arith.constant 0 : index
    %80 = vector.load %arg13[%c80, %c0_76] : memref<128x128xf32, #tpu.memory_space<vmem>>, vector<16x128xf32>
    %c0_77 = arith.constant 0 : index
    %c0_78 = arith.constant 0 : index
    %81 = vector.load %arg4[%c0_77, %c0_78] : memref<128x128xf32, #tpu.memory_space<vmem>>, vector<128x128xf32>
    %cst_79 = arith.constant dense<0.000000e+00> : vector<16x128xf32>
    %82 = tpu.matmul %71, %81, %cst_79 {dimension_numbers = #tpu.dot_dimension_numbers<[1], [0], [0], [1], [0, 0, 1, 1], [], []>} : vector<16x128xf32>, vector<128x128xf32>, vector<16x128xf32> -> vector<16x128xf32>
    %83 = arith.addf %80, %82 : vector<16x128xf32>
    %84 = math.tanh %83 : vector<16x128xf32>
    %c0_80 = arith.constant 0 : index
    %c0_81 = arith.constant 0 : index
    %85 = vector.load %arg5[%c0_80, %c0_81] : memref<128x128xf32, #tpu.memory_space<vmem>>, vector<128x128xf32>
    %cst_82 = arith.constant dense<0.000000e+00> : vector<16x128xf32>
    %86 = tpu.matmul %84, %85, %cst_82 {dimension_numbers = #tpu.dot_dimension_numbers<[1], [0], [0], [1], [0, 0, 1, 1], [], []>} : vector<16x128xf32>, vector<128x128xf32>, vector<16x128xf32> -> vector<16x128xf32>
    %c0_83 = arith.constant 0 : index
    %c0_84 = arith.constant 0 : index
    %87 = vector.load %arg6[%c0_83, %c0_84] : memref<128x128xf32, #tpu.memory_space<vmem>>, vector<128x128xf32>
    %cst_85 = arith.constant dense<0.000000e+00> : vector<16x128xf32>
    %88 = tpu.matmul %78, %87, %cst_85 {dimension_numbers = #tpu.dot_dimension_numbers<[1], [0], [0], [1], [0, 0, 1, 1], [], []>} : vector<16x128xf32>, vector<128x128xf32>, vector<16x128xf32> -> vector<16x128xf32>
    %89 = arith.addf %86, %88 : vector<16x128xf32>
    %90 = arith.addf %89, %10 : vector<16x128xf32>
    %91 = math.tanh %90 : vector<16x128xf32>
    %c80_86 = arith.constant 80 : index
    %c0_87 = arith.constant 0 : index
    %92 = vector.load %arg14[%c80_86, %c0_87] : memref<128x128xf32, #tpu.memory_space<vmem>>, vector<16x128xf32>
    tpu.vector_store %arg14[%c80_86, %c0_87], %91 {strides = array<i32>} : memref<128x128xf32, #tpu.memory_space<vmem>>, vector<16x128xf32>,
    %c96 = arith.constant 96 : index
    %c0_88 = arith.constant 0 : index
    %93 = vector.load %arg13[%c96, %c0_88] : memref<128x128xf32, #tpu.memory_space<vmem>>, vector<16x128xf32>
    %c0_89 = arith.constant 0 : index
    %c0_90 = arith.constant 0 : index
    %94 = vector.load %arg4[%c0_89, %c0_90] : memref<128x128xf32, #tpu.memory_space<vmem>>, vector<128x128xf32>
    %cst_91 = arith.constant dense<0.000000e+00> : vector<16x128xf32>
    %95 = tpu.matmul %84, %94, %cst_91 {dimension_numbers = #tpu.dot_dimension_numbers<[1], [0], [0], [1], [0, 0, 1, 1], [], []>} : vector<16x128xf32>, vector<128x128xf32>, vector<16x128xf32> -> vector<16x128xf32>
    %96 = arith.addf %93, %95 : vector<16x128xf32>
    %97 = math.tanh %96 : vector<16x128xf32>
    %c0_92 = arith.constant 0 : index
    %c0_93 = arith.constant 0 : index
    %98 = vector.load %arg5[%c0_92, %c0_93] : memref<128x128xf32, #tpu.memory_space<vmem>>, vector<128x128xf32>
    %cst_94 = arith.constant dense<0.000000e+00> : vector<16x128xf32>
    %99 = tpu.matmul %97, %98, %cst_94 {dimension_numbers = #tpu.dot_dimension_numbers<[1], [0], [0], [1], [0, 0, 1, 1], [], []>} : vector<16x128xf32>, vector<128x128xf32>, vector<16x128xf32> -> vector<16x128xf32>
    %c0_95 = arith.constant 0 : index
    %c0_96 = arith.constant 0 : index
    %100 = vector.load %arg6[%c0_95, %c0_96] : memref<128x128xf32, #tpu.memory_space<vmem>>, vector<128x128xf32>
    %cst_97 = arith.constant dense<0.000000e+00> : vector<16x128xf32>
    %101 = tpu.matmul %91, %100, %cst_97 {dimension_numbers = #tpu.dot_dimension_numbers<[1], [0], [0], [1], [0, 0, 1, 1], [], []>} : vector<16x128xf32>, vector<128x128xf32>, vector<16x128xf32> -> vector<16x128xf32>
    %102 = arith.addf %99, %101 : vector<16x128xf32>
    %103 = arith.addf %102, %10 : vector<16x128xf32>
    %104 = math.tanh %103 : vector<16x128xf32>
    %c96_98 = arith.constant 96 : index
    %c0_99 = arith.constant 0 : index
    %105 = vector.load %arg14[%c96_98, %c0_99] : memref<128x128xf32, #tpu.memory_space<vmem>>, vector<16x128xf32>
    tpu.vector_store %arg14[%c96_98, %c0_99], %104 {strides = array<i32>} : memref<128x128xf32, #tpu.memory_space<vmem>>, vector<16x128xf32>,
    %c112 = arith.constant 112 : index
    %c0_100 = arith.constant 0 : index
    %106 = vector.load %arg13[%c112, %c0_100] : memref<128x128xf32, #tpu.memory_space<vmem>>, vector<16x128xf32>
    %c0_101 = arith.constant 0 : index
    %c0_102 = arith.constant 0 : index
    %107 = vector.load %arg4[%c0_101, %c0_102] : memref<128x128xf32, #tpu.memory_space<vmem>>, vector<128x128xf32>
    %cst_103 = arith.constant dense<0.000000e+00> : vector<16x128xf32>
    %108 = tpu.matmul %97, %107, %cst_103 {dimension_numbers = #tpu.dot_dimension_numbers<[1], [0], [0], [1], [0, 0, 1, 1], [], []>} : vector<16x128xf32>, vector<128x128xf32>, vector<16x128xf32> -> vector<16x128xf32>
    %109 = arith.addf %106, %108 : vector<16x128xf32>
    %110 = math.tanh %109 : vector<16x128xf32>
    %c0_104 = arith.constant 0 : index
    %c0_105 = arith.constant 0 : index
    %111 = vector.load %arg5[%c0_104, %c0_105] : memref<128x128xf32, #tpu.memory_space<vmem>>, vector<128x128xf32>
    %cst_106 = arith.constant dense<0.000000e+00> : vector<16x128xf32>
    %112 = tpu.matmul %110, %111, %cst_106 {dimension_numbers = #tpu.dot_dimension_numbers<[1], [0], [0], [1], [0, 0, 1, 1], [], []>} : vector<16x128xf32>, vector<128x128xf32>, vector<16x128xf32> -> vector<16x128xf32>
    %c0_107 = arith.constant 0 : index
    %c0_108 = arith.constant 0 : index
    %113 = vector.load %arg6[%c0_107, %c0_108] : memref<128x128xf32, #tpu.memory_space<vmem>>, vector<128x128xf32>
    %cst_109 = arith.constant dense<0.000000e+00> : vector<16x128xf32>
    %114 = tpu.matmul %104, %113, %cst_109 {dimension_numbers = #tpu.dot_dimension_numbers<[1], [0], [0], [1], [0, 0, 1, 1], [], []>} : vector<16x128xf32>, vector<128x128xf32>, vector<16x128xf32> -> vector<16x128xf32>
    %115 = arith.addf %112, %114 : vector<16x128xf32>
    %116 = arith.addf %115, %10 : vector<16x128xf32>
    %117 = math.tanh %116 : vector<16x128xf32>
    %c112_110 = arith.constant 112 : index
    %c0_111 = arith.constant 0 : index
    %118 = vector.load %arg14[%c112_110, %c0_111] : memref<128x128xf32, #tpu.memory_space<vmem>>, vector<16x128xf32>
    tpu.vector_store %arg14[%c112_110, %c0_111], %117 {strides = array<i32>} : memref<128x128xf32, #tpu.memory_space<vmem>>, vector<16x128xf32>,
    %c0_112 = arith.constant 0 : index
    %c0_113 = arith.constant 0 : index
    %c0_114 = arith.constant 0 : index
    %119 = vector.load %arg12[%c0_112, %c0_113, %c0_114] : memref<2x16x128xf32, #tpu.memory_space<vmem>>, vector<1x16x128xf32>
    %120 = vector.shape_cast %119 : vector<1x16x128xf32> to vector<16x128xf32>
    %121 = vector.shape_cast %110 : vector<16x128xf32> to vector<1x16x128xf32>
    tpu.vector_store %arg12[%c0_112, %c0_113, %c0_114], %121 {strides = array<i32>} : memref<2x16x128xf32, #tpu.memory_space<vmem>>, vector<1x16x128xf32>,
    %c1_115 = arith.constant 1 : index
    %c0_116 = arith.constant 0 : index
    %c0_117 = arith.constant 0 : index
    %122 = vector.load %arg12[%c1_115, %c0_116, %c0_117] : memref<2x16x128xf32, #tpu.memory_space<vmem>>, vector<1x16x128xf32>
    %123 = vector.shape_cast %122 : vector<1x16x128xf32> to vector<16x128xf32>
    %124 = vector.shape_cast %117 : vector<16x128xf32> to vector<1x16x128xf32>
    tpu.vector_store %arg12[%c1_115, %c0_116, %c0_117], %124 {strides = array<i32>} : memref<2x16x128xf32, #tpu.memory_space<vmem>>, vector<1x16x128xf32>,
    %c0_118 = arith.constant 0 : index
    %c0_119 = arith.constant 0 : index
    %125 = vector.load %arg14[%c0_118, %c0_119] : memref<128x128xf32, #tpu.memory_space<vmem>>, vector<128x128xf32>
    %c0_120 = arith.constant 0 : index
    %c0_121 = arith.constant 0 : index
    %126 = vector.load %arg9[%c0_120, %c0_121] : memref<128x128xf32, #tpu.memory_space<vmem>>, vector<128x128xf32>
    %cst_122 = arith.constant dense<0.000000e+00> : vector<128x128xf32>
    %127 = tpu.matmul %125, %126, %cst_122 {dimension_numbers = #tpu.dot_dimension_numbers<[1], [0], [0], [1], [0, 0, 1, 1], [], []>} : vector<128x128xf32>, vector<128x128xf32>, vector<128x128xf32> -> vector<128x128xf32>
    %c0_123 = arith.constant 0 : index
    %c0_124 = arith.constant 0 : index
    %128 = vector.load %arg10[%c0_123, %c0_124] : memref<1x128xf32, #tpu.memory_space<vmem>>, vector<1x128xf32>
    %129 = vector.broadcast %128 : vector<1x128xf32> to vector<128x128xf32>
    %130 = arith.addf %127, %129 : vector<128x128xf32>
    %131 = vector.shape_cast %130 : vector<128x128xf32> to vector<8x16x128xf32>
    %c0_125 = arith.constant 0 : index
    %c0_126 = arith.constant 0 : index
    %c0_127 = arith.constant 0 : index
    %132 = vector.load %arg11[%c0_125, %c0_126, %c0_127] : memref<8x16x128xf32, #tpu.memory_space<vmem>>, vector<8x16x128xf32>
    tpu.vector_store %arg11[%c0_125, %c0_126, %c0_127], %131 {strides = array<i32>} : memref<8x16x128xf32, #tpu.memory_space<vmem>>, vector<8x16x128xf32>,
    return
  }
  func.func @transform_0(%arg0: i32) -> (i32, i32, i32) {
    %c0_i32 = arith.constant 0 : i32
    %c0_i32_0 = arith.constant 0 : i32
    %c0_i32_1 = arith.constant 0 : i32
    return %c0_i32, %arg0, %c0_i32_0 : i32, i32, i32
  }
  func.func @transform_1(%arg0: i32) -> (i32, i32, i32) {
    %c0_i32 = arith.constant 0 : i32
    %c0_i32_0 = arith.constant 0 : i32
    %c0_i32_1 = arith.constant 0 : i32
    return %c0_i32, %arg0, %c0_i32_0 : i32, i32, i32
  }
  func.func @transform_2(%arg0: i32) -> (i32, i32) {
    %c0_i32 = arith.constant 0 : i32
    %c0_i32_0 = arith.constant 0 : i32
    %c0_i32_1 = arith.constant 0 : i32
    return %c0_i32, %c0_i32_0 : i32, i32
  }
  func.func @transform_3(%arg0: i32) -> (i32, i32) {
    %c0_i32 = arith.constant 0 : i32
    %c0_i32_0 = arith.constant 0 : i32
    %c0_i32_1 = arith.constant 0 : i32
    return %c0_i32, %c0_i32_0 : i32, i32
  }
  func.func @transform_4(%arg0: i32) -> (i32, i32) {
    %c0_i32 = arith.constant 0 : i32
    %c0_i32_0 = arith.constant 0 : i32
    %c0_i32_1 = arith.constant 0 : i32
    return %c0_i32, %c0_i32_0 : i32, i32
  }
  func.func @transform_5(%arg0: i32) -> (i32, i32) {
    %c0_i32 = arith.constant 0 : i32
    %c0_i32_0 = arith.constant 0 : i32
    %c0_i32_1 = arith.constant 0 : i32
    return %c0_i32, %c0_i32_0 : i32, i32
  }
  func.func @transform_6(%arg0: i32) -> (i32, i32) {
    %c0_i32 = arith.constant 0 : i32
    %c0_i32_0 = arith.constant 0 : i32
    %c0_i32_1 = arith.constant 0 : i32
    return %c0_i32, %c0_i32_0 : i32, i32
  }
  func.func @transform_7(%arg0: i32) -> (i32, i32) {
    %c0_i32 = arith.constant 0 : i32
    %c0_i32_0 = arith.constant 0 : i32
    %c0_i32_1 = arith.constant 0 : i32
    return %c0_i32, %c0_i32_0 : i32, i32
  }
  func.func @transform_8(%arg0: i32) -> (i32, i32) {
    %c0_i32 = arith.constant 0 : i32
    %c0_i32_0 = arith.constant 0 : i32
    %c0_i32_1 = arith.constant 0 : i32
    return %c0_i32, %c0_i32_0 : i32, i32
  }
  func.func @transform_9(%arg0: i32) -> (i32, i32) {
    %c0_i32 = arith.constant 0 : i32
    %c0_i32_0 = arith.constant 0 : i32
    %c0_i32_1 = arith.constant 0 : i32
    return %c0_i32, %c0_i32_0 : i32, i32
  }
  func.func @transform_10(%arg0: i32) -> (i32, i32, i32) {
    %c0_i32 = arith.constant 0 : i32
    %c0_i32_0 = arith.constant 0 : i32
    %c0_i32_1 = arith.constant 0 : i32
    return %c0_i32, %arg0, %c0_i32_0 : i32, i32, i32
  }
  func.func @transform_11(%arg0: i32) -> (i32, i32, i32) {
    %c0_i32 = arith.constant 0 : i32
    %c0_i32_0 = arith.constant 0 : i32
    %c0_i32_1 = arith.constant 0 : i32
    return %c0_i32, %arg0, %c0_i32_0 : i32, i32, i32
  }
}

</mosaic_0001>

<bundles_post_ra>
// kernel: rnn_model_forward.1
= control target key start
LH: loop header
LB: loop body
LE: loop exit
PB: predicated region body
PF: predicated region fallthrough
CT: control target
= control target key end

     0   :  { %17 = vsyncpa [#allocation5], 0  ;;  %s6334_s0 = inlined_call_operand.vmem [shape: f32[8,16,28], index: 0, kind: input, shape index: {}]   ;;  %s6335_s1 = inlined_call_operand.vmem [shape: f32[2,16,128], index: 1, kind: input, shape index: {}]   ;;  %s6336_s2 = inlined_call_operand.vmem [shape: f32[28,128], index: 2, kind: input, shape index: {}]   ;;  %s6337_s3 = inlined_call_operand.vmem [shape: f32[128,128], index: 3, kind: input, shape index: {}]   ;;  %s6338_s4 = inlined_call_operand.vmem [shape: f32[128,128], index: 4, kind: input, shape index: {}]   ;;  %s6339_s5 = inlined_call_operand.hbm [shape: f32[128,128], index: 5, kind: input, shape index: {}]   ;;  %s6340_s6 = inlined_call_operand.vmem [shape: f32[1,128], index: 6, kind: input, shape index: {}]   ;;  %s6341_s7 = inlined_call_operand.vmem [shape: f32[1,128], index: 7, kind: input, shape index: {}]   ;;  %s6342_s8 = inlined_call_operand.hbm [shape: f32[128,128], index: 8, kind: input, shape index: {}]   ;;  %s6343_s9 = inlined_call_operand.vmem [shape: f32[1,128], index: 9, kind: input, shape index: {}]   ;;  %s6344_s10 = inlined_call_operand.vmem [shape: f32[8,16,128], index: 10, kind: output, shape index: {0}]   ;;  %s6345_s11 = inlined_call_operand.hbm [shape: f32[2,16,128], index: 11, kind: output, shape index: {1}]  }
   0x1   :  { %18 = vsyncpa [#allocation8], 0 }
   0x2   :  { %19 = vsyncpa [#allocation6], 0  ;;  %s5262_s17 = smov [#allocation4]   ;;  %s5190_s21 = scalar_lea.hbm %s6339_s5, 2048 }
   0x3   :  { %s35_s18 = sshll.u32 %s5262_s17, 4  ;;  %p5191_p0 = scmp.ne.s32.totalorder %s6339_s5, %s5190_s21  ;;  %s36_s18 = int_to_ptr.vmem [resolvable:$true] %s35_s18 }
   0x4   :  { %p5194_p1 = scmp.lt.u32.totalorder %s5190_s21, %s6339_s5 }
   0x6   :  { %p5196_p2 = pnand %p5194_p1, %p5191_p0 }
   0x8   :  { %5199 = shalt.err (!%p5196_p2)
}
   0x9   :  { %s5200_s26 = scalar_lea.vmem %s36_s18, 2048  ;;  %p5205_p4 = scmp.lt.s32.totalorder %s36_s18, %s36_s18 }
   0xa   :  { %p5201_p3 = scmp.ne.s32.totalorder %s36_s18, %s5200_s26  ;;  %p5206_p5 = scmp.lt.s32.totalorder %s5200_s26, %s5200_s26 }
   0xc   :  { %p5207_p6 = por %p5206_p5, %p5205_p4 }
   0xe   :  { %p5208_p7 = pnand %p5207_p6, %p5201_p3 }
  0x10   :  { %5211 = shalt.err (!%p5208_p7)
}
  0x11   :  { %s5263_s27 = smov 128   ;;  %s5264_s28 = smov 8  }
  0x12   :  { %41 = dma.hbm_to_vmem [thread:$0]  %s6339_s5, 2048, %s36_s18, [#allocation5], %s5263_s27, %s5263_s27, %s5264_s28  }
  0x13   :  { %s5265_s12 = smov [#allocation7]   ;;  %s5212_s16 = scalar_lea.hbm %s6342_s8, 2048 }
  0x14   :  { %s51_s13 = sshll.u32 %s5265_s12, 4  ;;  %p5213_p8 = scmp.ne.s32.totalorder %s6342_s8, %s5212_s16  ;;  %s52_s13 = int_to_ptr.vmem [resolvable:$true] %s51_s13 }
  0x15   :  { %p5216_p9 = scmp.lt.u32.totalorder %s5212_s16, %s6342_s8 }
  0x17   :  { %p5218_p10 = pnand %p5216_p9, %p5213_p8 }
  0x19   :  { %5221 = shalt.err (!%p5218_p10)
}
  0x1a   :  { %s5222_s22 = scalar_lea.vmem %s52_s13, 2048  ;;  %p5227_p12 = scmp.lt.s32.totalorder %s52_s13, %s52_s13 }
  0x1b   :  { %p5223_p11 = scmp.ne.s32.totalorder %s52_s13, %s5222_s22  ;;  %p5228_p13 = scmp.lt.s32.totalorder %s5222_s22, %s5222_s22 }
  0x1d   :  { %p5229_p0 = por %p5228_p13, %p5227_p12 }
  0x1f   :  { %p5230_p1 = pnand %p5229_p0, %p5223_p11 }
  0x21   :  { %5233 = shalt.err (!%p5230_p1)
}
  0x22   :  { %57 = dma.hbm_to_vmem [thread:$0]  %s6342_s8, 2048, %s52_s13, [#allocation8], %s5263_s27, %s5263_s27, %s5264_s28  }
  0x23   :  { %5256 = dma.done.wait [#allocation5], 2048  }
  0x24   :  { %5257 = vsyncadd [#allocation5], 4294965248 }
  0x25   :  { %5258 = dma.done.wait [#allocation8], 2048  }
  0x26   :  { %5259 = vsyncadd [#allocation8], 4294965248  ;;  %v321_v0 = vld [vmem:[%s6337_s3] sm:$0xff]  ;;  %v322_v1 = vld [vmem:[%s6337_s3 + $0x8] sm:$0xff]  ;;  %vm142_vm0 = vcmask 1043456   ;;  %vm93_vm1 = vcmask 228352  }
  0x27   :  { %v323_v2 = vld [vmem:[%s6337_s3 + $0x10] sm:$0xff]  ;;  %v5367_v3 = vpack.c.bf16 %v322_v1, %v321_v0  ;;  %v324_v4 = vld [vmem:[%s6337_s3 + $0x18] sm:$0xff]  ;;  %v325_v6 = vld [vmem:[%s6337_s3 + $0x20] sm:$0xff]  ;;  %vm5266_vm2 = vmmov 1   ;;  %s5267_s19 = smov [#allocation9]  }
  0x28   :  { %v5372_v5 = vpack.c.bf16 %v324_v4, %v323_v2  ;;  %v326_v7 = vld [vmem:[%s6337_s3 + $0x28] sm:$0xff]  ;;  %v82_v8 = vld [vmem:[%s6336_s2] sm:$0xff]  ;;  %v84_v12 = vld [vmem:[%s6336_s2 + $0x10] sm:$0xff]  ;;  %s2811_s20 = sshll.u32 %s5267_s19, 4  ;;  %s2812_s20 = int_to_ptr.vmem [resolvable:$true] %s2811_s20 }
  0x29   :  { %4271 = vmatprep.subr.bf16.mxu0 %v5367_v3  ;;  %v83_v9 = vld [vmem:[%s6336_s2 + $0x8] sm:$0xff]  ;;  %v5389_v10 = vpack.c.bf16 %v326_v7, %v325_v6  ;;  %v85_v13 = vld [vmem:[%s6336_s2 + $0x18] sm:$0xf]  ;;  %vm5397_vm3 = vmpackc.low %vm142_vm0, %vm5266_vm2  ;;  %s5234_s21 = scalar_lea.vmem %s2812_s20, 512  ;;  %p5239_p3 = scmp.lt.s32.totalorder %s2812_s20, %s2812_s20 }
  0x2a   :  { %4273 = vmatpush3.bf16.msra.mxu0 %v5367_v3  ;;  %v4260_v11 = vpack.c.bf16 %v83_v9, %v82_v8  ;;  %v327_v15 = vld [vmem:[%s6337_s3 + $0x30] sm:$0xff]  ;;  %v328_v16 = vld [vmem:[%s6337_s3 + $0x38] sm:$0xff]  ;;  %v4264_v17 = vpack.c.bf16 %v85_v13, %v84_v12  ;;  %v66_v18 = vld [vmem:[%s6334_s0] sm:$0xff]  ;;  %p5235_p2 = scmp.ne.s32.totalorder %s2812_s20, %s5234_s21  ;;  %p5240_p4 = scmp.lt.s32.totalorder %s5234_s21, %s5234_s21 }
  0x2b   :  { %4275 = vmatprep.subr.bf16.mxu0 %v5372_v5  ;;  %3340 = vmatprep.mubr.msk.f32.mxu1 %vm93_vm1, %v66_v18  ;;  %v314_v19 = vld [vmem:[%s6335_s1] sm:$0xff]  ;;  %v5416_v20 = vpack.c.bf16 %v328_v16, %v327_v15  ;;  %v330_v22 = vld [vmem:[%s6337_s3 + $0x48] sm:$0xff]  ;;  %v331_v27 = vld [vmem:[%s6337_s3 + $0x50] sm:$0xff] }
  0x2c   :  { %4261 = vmatprep.subr.bf16.mxu1 %v4260_v11  ;;  %v329_v21 = vld [vmem:[%s6337_s3 + $0x40] sm:$0xff]  ;;  %3396 = vmatprep.mubr.f32.mxu0 %v314_v19  ;;  %v67_v23 = vld [vmem:[%s6334_s0 + $0x8] sm:$0xff]  ;;  %v332_v28 = vld [vmem:[%s6337_s3 + $0x58] sm:$0xff]  ;;  %p5241_p5 = por %p5240_p4, %p5239_p3 }
  0x2d   :  { %4263 = vmatpush3.bf16.msra.mxu1 %v4260_v11  ;;  %v5433_v24 = vpack.c.bf16 %v330_v22, %v329_v21  ;;  %v416_v25 = vld [vmem:[%s6338_s4] sm:$0xff]  ;;  %v417_v26 = vld [vmem:[%s6338_s4 + $0x8] sm:$0xff]  ;;  %v68_v30 = vld [vmem:[%s6334_s0 + $0x10] sm:$0xff]  ;;  %v5470_v36 = vpack.c.bf16 %v332_v28, %v331_v27 }
  0x2e   :  { %4277 = vmatpush3.bf16.msra.mxu0 %v5372_v5  ;;  %4266 = vmatprep.subr.msk.bf16.mxu1 %vm5397_vm3, %v4264_v17  ;;  %v5447_v29 = vpack.c.bf16 %v417_v26, %v416_v25  ;;  %v418_v31 = vld [vmem:[%s6338_s4 + $0x10] sm:$0xff]  ;;  %v419_v32 = vld [vmem:[%s6338_s4 + $0x18] sm:$0xff]  ;;  %v420_v35 = vld [vmem:[%s6338_s4 + $0x20] sm:$0xff]  ;;  %p5242_p6 = pnand %p5241_p5, %p5235_p2 }
  0x2f   :  { %4279 = vmatprep.subr.bf16.mxu0 %v5389_v10  ;;  %v69_v33 = vld [vmem:[%s6334_s0 + $0x18] sm:$0xff]  ;;  %v5464_v34 = vpack.c.bf16 %v419_v32, %v418_v31  ;;  %v70_v37 = vld [vmem:[%s6334_s0 + $0x20] sm:$0xff]  ;;  %v421_v38 = vld [vmem:[%s6338_s4 + $0x28] sm:$0xff] }
  0x30   :  { %v333_v39 = vld [vmem:[%s6337_s3 + $0x60] sm:$0xff]  ;;  %v334_v40 = vld [vmem:[%s6337_s3 + $0x68] sm:$0xff]  ;;  %v5487_v41 = vpack.c.bf16 %v421_v38, %v420_v35  ;;  %v422_v42 = vld [vmem:[%s6338_s4 + $0x30] sm:$0xff] }
  0x31   :  { %4269 = vmatpush3.bf16.msk.msra.mxu1 %vm5397_vm3, %v4264_v17  ;;  %v423_v43 = vld [vmem:[%s6338_s4 + $0x38] sm:$0xff]  ;;  %v71_v44 = vld [vmem:[%s6334_s0 + $0x28] sm:$0xff]  ;;  %v5502_v45 = vpack.c.bf16 %v334_v40, %v333_v39  ;;  %v72_v46 = vld [vmem:[%s6334_s0 + $0x30] sm:$0xff] }
  0x32   :  { %4281 = vmatpush3.bf16.msra.mxu0 %v5389_v10  ;;  %4335 = vmatprep.subr.bf16.mxu1 %v5447_v29  ;;  %v335_v47 = vld [vmem:[%s6337_s3 + $0x70] sm:$0xff]  ;;  %v336_v48 = vld [vmem:[%s6337_s3 + $0x78] sm:$0xff]  ;;  %v5515_v49 = vpack.c.bf16 %v423_v43, %v422_v42  ;;  %v432_v52 = vld [vmem:[#allocation4] sm:$0xff] }
  0x33   :  { %4283 = vmatprep.subr.bf16.mxu0 %v5416_v20  ;;  %v73_v50 = vld [vmem:[%s6334_s0 + $0x38] sm:$0xff]  ;;  %v5524_v51 = vpack.c.bf16 %v336_v48, %v335_v47  ;;  %v433_v53 = vld [vmem:[#allocation4 + $0x8] sm:$0xff]  ;;  %v434_v55 = vld [vmem:[#allocation4 + $0x10] sm:$0xff] }
  0x34   :  { %3341 = vmatmul.mubr.msk.f32.vlgmr.msra.gmra.mrb[0].mxu1 %vm93_vm1, %v67_v23  ;;  %v5531_v54 = vpack.c.bf16 %v433_v53, %v432_v52  ;;  %v435_v56 = vld [vmem:[#allocation4 + $0x18] sm:$0xff]  ;;  %v315_v57 = vld [vmem:[%s6335_s1 + $0x8] sm:$0xff]  ;;  %v2845_v59 = vld [vmem:[%s6335_s1 + $0x10] sm:$0xff] }
  0x35   :  { %4337 = vmatpush3.bf16.msra.mxu1 %v5447_v29  ;;  %3343 = vmatprep.mubr.msk.f32.mxu1 %vm93_vm1, %v68_v30  ;;  %v5539_v58 = vpack.c.bf16 %v435_v56, %v434_v55  ;;  %v436_v60 = vld [vmem:[#allocation4 + $0x20] sm:$0xff]  ;;  %v437_v61 = vld [vmem:[#allocation4 + $0x28] sm:$0xff]  ;;  %v438_v63 = vld [vmem:[#allocation4 + $0x30] sm:$0xff] }
  0x36   :  { %4285 = vmatpush3.bf16.msra.mxu0 %v5416_v20  ;;  %4339 = vmatprep.subr.bf16.mxu1 %v5464_v34  ;;  %v5546_v62 = vpack.c.bf16 %v437_v61, %v436_v60  ;;  %v439_v0 = vld [vmem:[#allocation4 + $0x38] sm:$0xff]  ;;  %v440_v2 = vld [vmem:[#allocation4 + $0x40] sm:$0xff]  ;;  %v441_v4 = vld [vmem:[#allocation4 + $0x48] sm:$0xff] }
  0x37   :  { %4287 = vmatprep.subr.bf16.mxu0 %v5433_v24  ;;  %v5550_v1 = vpack.c.bf16 %v439_v0, %v438_v63  ;;  %v5554_v6 = vpack.c.bf16 %v441_v4, %v440_v2  ;;  %v442_v7 = vld [vmem:[#allocation4 + $0x50] sm:$0xff]  ;;  %v443_v8 = vld [vmem:[#allocation4 + $0x58] sm:$0xff]  ;;  %v444_v11 = vld [vmem:[#allocation4 + $0x60] sm:$0xff] }
  0x38   :  { %3344 = vmatmul.mubr.msk.f32.gmra.mrb[2].mxu1 %vm93_vm1, %v69_v33  ;;  %v5558_v9 = vpack.c.bf16 %v443_v8, %v442_v7  ;;  %v445_v12 = vld [vmem:[#allocation4 + $0x68] sm:$0xff]  ;;  %v446_v14 = vld [vmem:[#allocation4 + $0x70] sm:$0xff]  ;;  %v447_v15 = vld [vmem:[#allocation4 + $0x78] sm:$0xff] }
  0x39   :  { %3346 = vmatprep.mubr.msk.f32.mxu1 %vm93_vm1, %v70_v37  ;;  %4341 = vmatpush3.bf16.msra.mxu1 %v5464_v34  ;;  %v5562_v13 = vpack.c.bf16 %v445_v12, %v444_v11  ;;  %v5566_v16 = vpack.c.bf16 %v447_v15, %v446_v14  ;;  %v2846_v17 = vld [vmem:[%s6335_s1 + $0x18] sm:$0xff]  ;;  %v74_v18 = vld [vmem:[%s6334_s0 + $0x40] sm:$0xff]  ;;  %v75_v19 = vld [vmem:[%s6334_s0 + $0x48] sm:$0xff] }
  0x3a   :  { %4289 = vmatpush3.bf16.msra.mxu0 %v5433_v24  ;;  %4343 = vmatprep.subr.bf16.mxu1 %v5487_v41  ;;  %v424_v21 = vld [vmem:[%s6338_s4 + $0x40] sm:$0xff]  ;;  %v425_v22 = vld [vmem:[%s6338_s4 + $0x48] sm:$0xff]  ;;  %v76_v25 = vld [vmem:[%s6334_s0 + $0x50] sm:$0xff] }
  0x3b   :  { %4291 = vmatprep.subr.bf16.mxu0 %v5470_v36  ;;  %v5605_v23 = vpack.c.bf16 %v425_v22, %v424_v21  ;;  %v426_v26 = vld [vmem:[%s6338_s4 + $0x50] sm:$0xff]  ;;  %v427_v27 = vld [vmem:[%s6338_s4 + $0x58] sm:$0xff]  ;;  %v78_v31 = vld [vmem:[%s6334_s0 + $0x60] sm:$0xff] }
  0x3c   :  { %3347 = vmatmul.mubr.msk.f32.gmra.mrb[4].mxu1 %vm93_vm1, %v71_v44  ;;  %v77_v28 = vld [vmem:[%s6334_s0 + $0x58] sm:$0xff]  ;;  %v5622_v30 = vpack.c.bf16 %v427_v27, %v426_v26  ;;  %v79_v32 = vld [vmem:[%s6334_s0 + $0x68] sm:$0xff]  ;;  %v428_v33 = vld [vmem:[%s6338_s4 + $0x60] sm:$0xff] }
  0x3d   :  { %3349 = vmatprep.mubr.msk.f32.mxu1 %vm93_vm1, %v72_v46  ;;  %4345 = vmatpush3.bf16.msra.mxu1 %v5487_v41  ;;  %v429_v35 = vld [vmem:[%s6338_s4 + $0x68] sm:$0xff]  ;;  %v80_v37 = vld [vmem:[%s6334_s0 + $0x70] sm:$0xff]  ;;  %v431_v40 = vld [vmem:[%s6338_s4 + $0x78] sm:$0xff] }
  0x3e   :  { %4293 = vmatpush3.bf16.msra.mxu0 %v5470_v36  ;;  %4347 = vmatprep.subr.bf16.mxu1 %v5515_v49  ;;  %v5643_v38 = vpack.c.bf16 %v429_v35, %v428_v33  ;;  %v430_v39 = vld [vmem:[%s6338_s4 + $0x70] sm:$0xff]  ;;  %v81_v43 = vld [vmem:[%s6334_s0 + $0x78] sm:$0xff]  ;;  %v5679_v56 = vld [vmem:[%s6340_s6] ss:$0 sm:$0xff] }
  0x3f   :  { %4295 = vmatprep.subr.bf16.mxu0 %v5502_v45  ;;  %v5652_v42 = vpack.c.bf16 %v431_v40, %v430_v39  ;;  %v5738_v26 = vld [vmem:[%s6341_s7] ss:$0 sm:$0xff] }
  0x40   :  { %3350 = vmatmul.mubr.msk.f32.gmra.mrb[6].mxu1 %vm93_vm1, %v73_v50 }
  0x41   :  { %4349 = vmatpush3.bf16.msra.mxu1 %v5515_v49  ;;  %3352 = vmatprep.mubr.msk.f32.mxu1 %vm93_vm1, %v74_v18 }
  0x42   :  { %4297 = vmatpush3.bf16.msra.mxu0 %v5502_v45  ;;  %4351 = vmatprep.subr.bf16.mxu1 %v5605_v23 }
  0x43   :  { %4299 = vmatprep.subr.bf16.mxu0 %v5524_v51 }
  0x44   :  { %3353 = vmatmul.mubr.msk.f32.gmra.mrb[8].mxu1 %vm93_vm1, %v75_v19 }
  0x45   :  { %4353 = vmatpush3.bf16.msra.mxu1 %v5605_v23  ;;  %3355 = vmatprep.mubr.msk.f32.mxu1 %vm93_vm1, %v76_v25 }
  0x46   :  { %4301 = vmatpush3.bf16.msra.mxu0 %v5524_v51  ;;  %4355 = vmatprep.subr.bf16.mxu1 %v5622_v30 }
  0x47   :  { %4303 = vmatprep.subr.bf16.mxu0 %v5531_v54 }
  0x48   :  { %3356 = vmatmul.mubr.msk.f32.gmra.mrb[10].mxu1 %vm93_vm1, %v77_v28 }
  0x49   :  { %3397 = vmatmul.mubr.f32.vlgmr.msra.gmra.mrb[0].mxu0 %v315_v57  ;;  %4357 = vmatpush3.bf16.msra.mxu1 %v5622_v30 }
  0x4a   :  { %4305 = vmatpush3.bf16.msra.mxu0 %v5531_v54  ;;  %3431 = vmatprep.mubr.f32.mxu0 %v2845_v59 }
  0x4b   :  { %4307 = vmatprep.subr.bf16.mxu0 %v5539_v58  ;;  %3358 = vmatprep.mubr.msk.f32.mxu1 %vm93_vm1, %v78_v31 }
  0x4c   :  { %3359 = vmatmul.mubr.msk.f32.gmra.mrb[12].mxu1 %vm93_vm1, %v79_v32  ;;  %4359 = vmatprep.subr.bf16.mxu1 %v5643_v38 }
  0x4d   :  { %3361 = vmatprep.mubr.msk.f32.mxu1 %vm93_vm1, %v80_v37  ;;  %4361 = vmatpush3.bf16.msra.mxu1 %v5643_v38 }
  0x4e   :  { %4309 = vmatpush3.bf16.msra.mxu0 %v5539_v58  ;;  %4363 = vmatprep.subr.bf16.mxu1 %v5652_v42 }
  0x4f   :  { %4311 = vmatprep.subr.bf16.mxu0 %v5546_v62 }
  0x50   :  { %3362 = vmatmul.mubr.msk.f32.gmra.mrb[14].mxu1 %vm93_vm1, %v81_v43 }
  0x51   :  { %4365 = vmatpush3.bf16.msra.mxu1 %v5652_v42 }
  0x52   :  { %4313 = vmatpush3.bf16.msra.mxu0 %v5546_v62  ;;  %4399 = vmatprep.subr.bf16.mxu1 %v5531_v54 }
  0x53   :  { %4315 = vmatprep.subr.bf16.mxu0 %v5550_v1 }
  0x56   :  { %4317 = vmatpush3.bf16.msra.mxu0 %v5550_v1 }
  0x57   :  { %4319 = vmatprep.subr.bf16.mxu0 %v5554_v6 }
  0x5a   :  { %4321 = vmatpush3.bf16.msra.mxu0 %v5554_v6 }
  0x5b   :  { %4323 = vmatprep.subr.bf16.mxu0 %v5558_v9 }
  0x5e   :  { %4325 = vmatpush3.bf16.msra.mxu0 %v5558_v9 }
  0x5f   :  { %4327 = vmatprep.subr.bf16.mxu0 %v5562_v13 }
  0x62   :  { %4329 = vmatpush3.bf16.msra.mxu0 %v5562_v13 }
  0x63   :  { %4331 = vmatprep.subr.bf16.mxu0 %v5566_v16 }
  0x66   :  { %4333 = vmatpush3.bf16.msra.mxu0 %v5566_v16 }
  0x67   :  { %4367 = vmatprep.subr.bf16.mxu0 %v5367_v3 }
  0x69   :  { %3432 = vmatmul.mubr.f32.vlgmr.msra.gmra.mrb[2].mxu0 %v2846_v17 }
  0x6a   :  { %4369 = vmatpush3.bf16.msra.mxu0 %v5367_v3 }
  0x6b   :  { %4371 = vmatprep.subr.bf16.mxu0 %v5372_v5 }
  0x6e   :  { %4373 = vmatpush3.bf16.msra.mxu0 %v5372_v5 }
  0x6f   :  { %4375 = vmatprep.subr.bf16.mxu0 %v5389_v10 }
  0x72   :  { %4377 = vmatpush3.bf16.msra.mxu0 %v5389_v10 }
  0x73   :  { %4379 = vmatprep.subr.bf16.mxu0 %v5416_v20 }
  0x76   :  { %4381 = vmatpush3.bf16.msra.mxu0 %v5416_v20 }
  0x77   :  { %4383 = vmatprep.subr.bf16.mxu0 %v5433_v24 }
  0x7a   :  { %4385 = vmatpush3.bf16.msra.mxu0 %v5433_v24 }
  0x7b   :  { %4387 = vmatprep.subr.bf16.mxu0 %v5470_v36 }
  0x7e   :  { %4389 = vmatpush3.bf16.msra.mxu0 %v5470_v36 }
  0x7f   :  { %4391 = vmatprep.subr.bf16.mxu0 %v5502_v45 }
  0x82   :  { %4393 = vmatpush3.bf16.msra.mxu0 %v5502_v45 }
  0x83   :  { %4395 = vmatprep.subr.bf16.mxu0 %v5524_v51 }
  0x86   :  { %4397 = vmatpush3.bf16.msra.mxu0 %v5524_v51 }
  0x87   :  { %4463 = vmatprep.subr.bf16.mxu0 %v5367_v3 }
 0x107   :  { %v3342_v44 = vpop.f32.mrb[0].mxu1 }
 0x108   :  { %v212_v46 = vpop.f32.mrb[1].mxu1  ;;  %v218_v57 = vadd.f32 %v3342_v44, %v5679_v56 }
 0x109   :  { %v213_v59 = vadd.f32 %v5679_v56, %v212_v46 }
 0x10b   :  { %v5664_v47 = vpop.f32.mrb[2].mxu1 }
 0x10c   :  { %v5666_v48 = vpop.f32.mrb[3].mxu1  ;;  %v228_v22 = vadd.f32 %v5664_v47, %v5679_v56 }
 0x10d   :  { %v223_v25 = vadd.f32 %v5679_v56, %v5666_v48 }
 0x10f   :  { %v5668_v50 = vpop.f32.mrb[4].mxu1 }
 0x110   :  { %v5670_v52 = vpop.f32.mrb[5].mxu1 }
 0x113   :  { %v5672_v53 = vpop.f32.mrb[6].mxu1 }
 0x114   :  { %v5674_v55 = vpop.f32.mrb[7].mxu1 }
 0x117   :  { %v5715_v11 = vpop.f32.mrb[8].mxu1 }
 0x118   :  { %v5717_v12 = vpop.f32.mrb[9].mxu1 }
 0x11b   :  { %v5719_v14 = vpop.f32.mrb[10].mxu1 }
 0x11c   :  { %v3398_v60 = vpop.f32.mrb[0].mxu0  ;;  %v5721_v15 = vpop.f32.mrb[11].mxu1 }
 0x11d   :  { %v413_v61 = vadd.f32 %v3398_v60, %v218_v57  ;;  %v403_v63 = vpop.f32.mrb[1].mxu0 }
 0x11e   :  { %v412_v0 = vadd.f32 %v403_v63, %v213_v59 }
 0x11f   :  { %v5723_v17 = vpop.f32.mrb[12].mxu1 }
 0x120   :  { %5124 = vtanh.f32 %v412_v0  ;;  %v5725_v18 = vpop.f32.mrb[13].mxu1  ;;  %v1467_v0 = vld [vmem:[%s6337_s3 + $0x30] sm:$0xff] }
 0x121   :  { %5126 = vtanh.f32 %v413_v61 }
 0x123   :  { %v5727_v19 = vpop.f32.mrb[14].mxu1 }
 0x124   :  { %v5729_v21 = vpop.f32.mrb[15].mxu1 }
 0x12a   :  { %v5125_v2 = vpop.eup %5124 }
 0x12b   :  { %v5127_v4 = vpop.eup %5126  ;;  %3466 = vmatprep.mubr.f32.mxu1 %v5125_v2  ;;  %3501 = vmatprep.mubr.f32.mxu0 %v5125_v2  ;;  %v1468_v2 = vld [vmem:[%s6337_s3 + $0x38] sm:$0xff] }
 0x12c   :  { %3467 = vmatmul.mubr.f32.vlgmr.msra.gmra.mrb[16].mxu1 %v5127_v4  ;;  %3502 = vmatmul.mubr.f32.vlgmr.msra.gmra.mrb[4].mxu0 %v5127_v4  ;;  %v5875_v4 = vpack.c.bf16 %v1468_v2, %v1467_v0  ;;  %v1584_v0 = vld [vmem:[#allocation4 + $0x60] sm:$0xff]  ;;  %v1585_v2 = vld [vmem:[#allocation4 + $0x68] sm:$0xff] }
 0x12d   :  { %4465 = vmatpush3.bf16.msra.mxu0 %v5367_v3  ;;  %4401 = vmatpush3.bf16.msra.mxu1 %v5531_v54 }
 0x12e   :  { %4467 = vmatprep.subr.bf16.mxu0 %v5372_v5  ;;  %4403 = vmatprep.subr.bf16.mxu1 %v5539_v58 }
 0x131   :  { %4469 = vmatpush3.bf16.msra.mxu0 %v5372_v5  ;;  %4405 = vmatpush3.bf16.msra.mxu1 %v5539_v58 }
 0x132   :  { %4471 = vmatprep.subr.bf16.mxu0 %v5389_v10  ;;  %4407 = vmatprep.subr.bf16.mxu1 %v5546_v62 }
 0x135   :  { %4473 = vmatpush3.bf16.msra.mxu0 %v5389_v10  ;;  %4409 = vmatpush3.bf16.msra.mxu1 %v5546_v62 }
 0x136   :  { %4475 = vmatprep.subr.bf16.mxu0 %v5416_v20  ;;  %4411 = vmatprep.subr.bf16.mxu1 %v5550_v1 }
 0x139   :  { %4477 = vmatpush3.bf16.msra.mxu0 %v5416_v20  ;;  %4413 = vmatpush3.bf16.msra.mxu1 %v5550_v1 }
 0x13a   :  { %4479 = vmatprep.subr.bf16.mxu0 %v5433_v24  ;;  %4415 = vmatprep.subr.bf16.mxu1 %v5554_v6 }
 0x13c   :  { %v3433_v7 = vpop.f32.mrb[2].mxu0 }
 0x13d   :  { %v514_v8 = vpop.f32.mrb[3].mxu0  ;;  %4481 = vmatpush3.bf16.msra.mxu0 %v5433_v24  ;;  %4417 = vmatpush3.bf16.msra.mxu1 %v5554_v6 }
 0x13e   :  { %4483 = vmatprep.subr.bf16.mxu0 %v5470_v36  ;;  %4419 = vmatprep.subr.bf16.mxu1 %v5558_v9 }
 0x141   :  { %4485 = vmatpush3.bf16.msra.mxu0 %v5470_v36  ;;  %4421 = vmatpush3.bf16.msra.mxu1 %v5558_v9 }
 0x142   :  { %4487 = vmatprep.subr.bf16.mxu0 %v5502_v45  ;;  %4423 = vmatprep.subr.bf16.mxu1 %v5562_v13 }
 0x145   :  { %4489 = vmatpush3.bf16.msra.mxu0 %v5502_v45  ;;  %4425 = vmatpush3.bf16.msra.mxu1 %v5562_v13 }
 0x146   :  { %4491 = vmatprep.subr.bf16.mxu0 %v5524_v51  ;;  %4427 = vmatprep.subr.bf16.mxu1 %v5566_v16 }
 0x149   :  { %4493 = vmatpush3.bf16.msra.mxu0 %v5524_v51  ;;  %4429 = vmatpush3.bf16.msra.mxu1 %v5566_v16 }
 0x14a   :  { %4431 = vmatprep.subr.bf16.mxu1 %v5447_v29  ;;  %4495 = vmatprep.subr.bf16.mxu0 %v5531_v54 }
 0x1ff   :  { %v3468_v27 = vpop.f32.mrb[16].mxu1  ;;  %v3503_v28 = vpop.f32.mrb[4].mxu0 }
 0x200   :  { %v595_v31 = vadd.f32 %v3468_v27, %v3433_v7  ;;  %v698_v32 = vadd.f32 %v3503_v28, %v228_v22  ;;  %v589_v33 = vpop.f32.mrb[17].mxu1  ;;  %v688_v35 = vpop.f32.mrb[5].mxu0  ;;  %v1469_v7 = vld [vmem:[%s6337_s3 + $0x40] sm:$0xff]  ;;  %v1472_v27 = vld [vmem:[%s6337_s3 + $0x58] sm:$0xff] }
 0x201   :  { %v590_v37 = vadd.f32 %v589_v33, %v514_v8  ;;  %v697_v39 = vadd.f32 %v688_v35, %v223_v25  ;;  %v1470_v8 = vld [vmem:[%s6337_s3 + $0x48] sm:$0xff]  ;;  %v1471_v25 = vld [vmem:[%s6337_s3 + $0x50] sm:$0xff] }
 0x202   :  { %v599_v40 = vadd.f32 %v5738_v26, %v595_v31  ;;  %v5885_v22 = vpack.c.bf16 %v1470_v8, %v1469_v7  ;;  %v5895_v28 = vpack.c.bf16 %v1472_v27, %v1471_v25  ;;  %v1473_v31 = vld [vmem:[%s6337_s3 + $0x60] sm:$0xff]  ;;  %v1475_v35 = vld [vmem:[%s6337_s3 + $0x70] sm:$0xff]  ;;  %v5987_v8 = vpack.c.bf16 %v1585_v2, %v1584_v0  ;;  %v1587_v25 = vld [vmem:[#allocation4 + $0x78] sm:$0xff] }
 0x203   :  { %v598_v43 = vadd.f32 %v5738_v26, %v590_v37  ;;  %5128 = vtanh.f32 %v697_v39  ;;  %v1476_v37 = vld [vmem:[%s6337_s3 + $0x78] sm:$0xff]  ;;  %v1586_v7 = vld [vmem:[#allocation4 + $0x70] sm:$0xff] }
 0x204   :  { %5130 = vtanh.f32 %v698_v32  ;;  %v1474_v32 = vld [vmem:[%s6337_s3 + $0x68] sm:$0xff]  ;;  %v5915_v39 = vpack.c.bf16 %v1476_v37, %v1475_v35  ;;  %v5989_v27 = vpack.c.bf16 %v1587_v25, %v1586_v7  ;;  %v258_v37 = vadd.f32 %v5715_v11, %v5679_v56  ;;  %v1558_v11 = vld [vmem:[%s6338_s4 + $0x10] sm:$0xff]  ;;  %v1567_v0 = vld [vmem:[%s6338_s4 + $0x58] sm:$0xff] }
 0x205   :  { %5132 = vtanh.f32 %v598_v43  ;;  %v5905_v33 = vpack.c.bf16 %v1474_v32, %v1473_v31  ;;  %v1556_v31 = vld [vmem:[%s6338_s4] sm:$0xff]  ;;  %v1557_v32 = vld [vmem:[%s6338_s4 + $0x8] sm:$0xff] }
 0x206   :  { %5134 = vtanh.f32 %v599_v40  ;;  %v6001_v35 = vpack.c.bf16 %v1557_v32, %v1556_v31  ;;  %v1568_v7 = vld [vmem:[%s6338_s4 + $0x60] sm:$0xff]  ;;  %v1569_v25 = vld [vmem:[%s6338_s4 + $0x68] sm:$0xff]  ;;  %v1570_v32 = vld [vmem:[%s6338_s4 + $0x70] sm:$0xff] }
 0x207   :  { %v6080_v31 = vpack.c.bf16 %v1569_v25, %v1568_v7  ;;  %v2625_v7 = vld [vmem:[#allocation7 + $0x28] sm:$0xff] }
 0x20d   :  { %v5129_v44 = vpop.eup %5128 }
 0x20e   :  { %v5131_v46 = vpop.eup %5130  ;;  %3606 = vmatprep.mubr.f32.mxu0 %v5129_v44 }
 0x20f   :  { %v5742_v47 = vpop.eup %5132  ;;  %3607 = vmatmul.mubr.f32.vlgmr.msra.gmra.mrb[6].mxu0 %v5131_v46 }
 0x210   :  { %v5744_v48 = vpop.eup %5134  ;;  %3536 = vmatprep.mubr.f32.mxu1 %v5742_v47  ;;  %4497 = vmatpush3.bf16.msra.mxu0 %v5531_v54 }
 0x211   :  { %3537 = vmatmul.mubr.f32.vlgmr.msra.gmra.mrb[18].mxu1 %v5744_v48  ;;  %4499 = vmatprep.subr.bf16.mxu0 %v5539_v58 }
 0x212   :  { %4433 = vmatpush3.bf16.msra.mxu1 %v5447_v29  ;;  %3571 = vmatprep.mubr.f32.mxu1 %v5129_v44 }
 0x213   :  { %4435 = vmatprep.subr.bf16.mxu1 %v5464_v34 }
 0x214   :  { %4501 = vmatpush3.bf16.msra.mxu0 %v5539_v58 }
 0x215   :  { %4503 = vmatprep.subr.bf16.mxu0 %v5546_v62 }
 0x216   :  { %4437 = vmatpush3.bf16.msra.mxu1 %v5464_v34 }
 0x217   :  { %4439 = vmatprep.subr.bf16.mxu1 %v5487_v41 }
 0x218   :  { %4505 = vmatpush3.bf16.msra.mxu0 %v5546_v62 }
 0x219   :  { %4507 = vmatprep.subr.bf16.mxu0 %v5550_v1 }
 0x21a   :  { %4441 = vmatpush3.bf16.msra.mxu1 %v5487_v41 }
 0x21b   :  { %4443 = vmatprep.subr.bf16.mxu1 %v5515_v49 }
 0x21c   :  { %4509 = vmatpush3.bf16.msra.mxu0 %v5550_v1 }
 0x21d   :  { %4511 = vmatprep.subr.bf16.mxu0 %v5554_v6 }
 0x21e   :  { %4445 = vmatpush3.bf16.msra.mxu1 %v5515_v49 }
 0x21f   :  { %4447 = vmatprep.subr.bf16.mxu1 %v5605_v23 }
 0x220   :  { %4513 = vmatpush3.bf16.msra.mxu0 %v5554_v6 }
 0x221   :  { %4515 = vmatprep.subr.bf16.mxu0 %v5558_v9 }
 0x222   :  { %4449 = vmatpush3.bf16.msra.mxu1 %v5605_v23 }
 0x223   :  { %4451 = vmatprep.subr.bf16.mxu1 %v5622_v30 }
 0x224   :  { %4517 = vmatpush3.bf16.msra.mxu0 %v5558_v9 }
 0x225   :  { %4519 = vmatprep.subr.bf16.mxu0 %v5562_v13 }
 0x226   :  { %4453 = vmatpush3.bf16.msra.mxu1 %v5622_v30 }
 0x227   :  { %4455 = vmatprep.subr.bf16.mxu1 %v5643_v38 }
 0x228   :  { %4521 = vmatpush3.bf16.msra.mxu0 %v5562_v13 }
 0x229   :  { %4523 = vmatprep.subr.bf16.mxu0 %v5566_v16 }
 0x22a   :  { %4457 = vmatpush3.bf16.msra.mxu1 %v5643_v38 }
 0x22b   :  { %4459 = vmatprep.subr.bf16.mxu1 %v5652_v42 }
 0x22c   :  { %4525 = vmatpush3.bf16.msra.mxu0 %v5566_v16 }
 0x22d   :  { %4527 = vmatprep.subr.bf16.mxu0 %v5447_v29 }
 0x22e   :  { %4461 = vmatpush3.bf16.msra.mxu1 %v5652_v42 }
 0x22f   :  { %4591 = vmatprep.subr.bf16.mxu1 %v5531_v54 }
 0x231   :  { %3572 = vmatmul.mubr.f32.vlgmr.msra.gmra.mrb[18].mxu1 %v5131_v46 }
 0x232   :  { %4593 = vmatpush3.bf16.msra.mxu1 %v5531_v54  ;;  %v238_v54 = vadd.f32 %v5668_v50, %v5679_v56 }
 0x233   :  { %4595 = vmatprep.subr.bf16.mxu1 %v5539_v58 }
 0x236   :  { %4597 = vmatpush3.bf16.msra.mxu1 %v5539_v58  ;;  %v233_v58 = vadd.f32 %v5679_v56, %v5670_v52 }
 0x237   :  { %4599 = vmatprep.subr.bf16.mxu1 %v5546_v62 }
 0x23a   :  { %4601 = vmatpush3.bf16.msra.mxu1 %v5546_v62 }
 0x23b   :  { %4603 = vmatprep.subr.bf16.mxu1 %v5550_v1 }
 0x23e   :  { %4605 = vmatpush3.bf16.msra.mxu1 %v5550_v1 }
 0x23f   :  { %4607 = vmatprep.subr.bf16.mxu1 %v5554_v6 }
 0x242   :  { %4609 = vmatpush3.bf16.msra.mxu1 %v5554_v6 }
 0x243   :  { %4611 = vmatprep.subr.bf16.mxu1 %v5558_v9 }
 0x246   :  { %4613 = vmatpush3.bf16.msra.mxu1 %v5558_v9 }
 0x247   :  { %4615 = vmatprep.subr.bf16.mxu1 %v5562_v13 }
 0x24a   :  { %4617 = vmatpush3.bf16.msra.mxu1 %v5562_v13 }
 0x24b   :  { %4619 = vmatprep.subr.bf16.mxu1 %v5566_v16 }
 0x24e   :  { %4621 = vmatpush3.bf16.msra.mxu1 %v5566_v16 }
 0x24f   :  { %4623 = vmatprep.subr.bf16.mxu1 %v5447_v29 }
 0x2e2   :  { %v3608_v62 = vpop.f32.mrb[6].mxu0 }
 0x2e3   :  { %v983_v1 = vadd.f32 %v3608_v62, %v238_v54  ;;  %v973_v6 = vpop.f32.mrb[7].mxu0  ;;  %v248_v62 = vadd.f32 %v5672_v53, %v5679_v56 }
 0x2e4   :  { %v982_v9 = vadd.f32 %v973_v6, %v233_v58 }
 0x304   :  { %v3573_v57 = vpop.f32.mrb[18].mxu1 }
 0x305   :  { %v884_v59 = vadd.f32 %v3573_v57, %v5738_v26  ;;  %v874_v13 = vpop.f32.mrb[19].mxu1  ;;  %v1575_v57 = vld [vmem:[#allocation4 + $0x18] sm:$0xff] }
 0x306   :  { %v883_v60 = vadd.f32 %v5738_v26, %v874_v13  ;;  %v1576_v13 = vld [vmem:[#allocation4 + $0x20] sm:$0xff] }
 0x308   :  { %5136 = vtanh.f32 %v883_v60  ;;  %v1577_v60 = vld [vmem:[#allocation4 + $0x28] sm:$0xff] }
 0x309   :  { %5138 = vtanh.f32 %v884_v59 }
 0x30a   :  { %5140 = vtanh.f32 %v982_v9 }
 0x30b   :  { %5142 = vtanh.f32 %v983_v1 }
 0x312   :  { %v5802_v16 = vpop.eup %5136 }
 0x313   :  { %v5804_v61 = vpop.eup %5138  ;;  %3641 = vmatprep.mubr.f32.mxu0 %v5802_v16 }
 0x314   :  { %v5141_v50 = vpop.eup %5140  ;;  %3642 = vmatmul.mubr.f32.vlgmr.msra.gmra.mrb[8].mxu0 %v5804_v61 }
 0x315   :  { %4529 = vmatpush3.bf16.msra.mxu0 %v5447_v29  ;;  %3676 = vmatprep.mubr.f32.mxu0 %v5141_v50  ;;  %v5143_v52 = vpop.eup %5142 }
 0x316   :  { %4531 = vmatprep.subr.bf16.mxu0 %v5464_v34 }
 0x319   :  { %4533 = vmatpush3.bf16.msra.mxu0 %v5464_v34 }
 0x31a   :  { %4535 = vmatprep.subr.bf16.mxu0 %v5487_v41 }
 0x31d   :  { %4537 = vmatpush3.bf16.msra.mxu0 %v5487_v41 }
 0x31e   :  { %4539 = vmatprep.subr.bf16.mxu0 %v5515_v49 }
 0x321   :  { %4541 = vmatpush3.bf16.msra.mxu0 %v5515_v49 }
 0x322   :  { %4543 = vmatprep.subr.bf16.mxu0 %v5605_v23 }
 0x325   :  { %4545 = vmatpush3.bf16.msra.mxu0 %v5605_v23 }
 0x326   :  { %4547 = vmatprep.subr.bf16.mxu0 %v5622_v30 }
 0x329   :  { %4549 = vmatpush3.bf16.msra.mxu0 %v5622_v30 }
 0x32a   :  { %4551 = vmatprep.subr.bf16.mxu0 %v5643_v38 }
 0x32d   :  { %4553 = vmatpush3.bf16.msra.mxu0 %v5643_v38 }
 0x32e   :  { %4555 = vmatprep.subr.bf16.mxu0 %v5652_v42 }
 0x331   :  { %4557 = vmatpush3.bf16.msra.mxu0 %v5652_v42 }
 0x332   :  { %4559 = vmatprep.subr.bf16.mxu0 %v5367_v3 }
 0x334   :  { %3677 = vmatmul.mubr.f32.vlgmr.msra.gmra.mrb[8].mxu0 %v5143_v52 }
 0x335   :  { %4561 = vmatpush3.bf16.msra.mxu0 %v5367_v3  ;;  %3711 = vmatprep.mubr.f32.mxu0 %v5141_v50  ;;  %v1461_v3 = vld [vmem:[%s6337_s3] sm:$0xff]  ;;  %v1579_v50 = vld [vmem:[#allocation4 + $0x38] sm:$0xff] }
 0x336   :  { %4563 = vmatprep.subr.bf16.mxu0 %v5372_v5 }
 0x339   :  { %4565 = vmatpush3.bf16.msra.mxu0 %v5372_v5  ;;  %v1462_v5 = vld [vmem:[%s6337_s3 + $0x8] sm:$0xff] }
 0x33a   :  { %4567 = vmatprep.subr.bf16.mxu0 %v5389_v10 }
 0x33d   :  { %4569 = vmatpush3.bf16.msra.mxu0 %v5389_v10  ;;  %v5845_v10 = vpack.c.bf16 %v1462_v5, %v1461_v3  ;;  %v1580_v3 = vld [vmem:[#allocation4 + $0x40] sm:$0xff]  ;;  %v1581_v5 = vld [vmem:[#allocation4 + $0x48] sm:$0xff] }
 0x33e   :  { %4571 = vmatprep.subr.bf16.mxu0 %v5416_v20 }
 0x341   :  { %4573 = vmatpush3.bf16.msra.mxu0 %v5416_v20  ;;  %v1463_v20 = vld [vmem:[%s6337_s3 + $0x10] sm:$0xff] }
 0x342   :  { %4575 = vmatprep.subr.bf16.mxu0 %v5433_v24 }
 0x345   :  { %4577 = vmatpush3.bf16.msra.mxu0 %v5433_v24  ;;  %v1464_v24 = vld [vmem:[%s6337_s3 + $0x18] sm:$0xff] }
 0x346   :  { %4579 = vmatprep.subr.bf16.mxu0 %v5470_v36 }
 0x349   :  { %4581 = vmatpush3.bf16.msra.mxu0 %v5470_v36  ;;  %v5855_v36 = vpack.c.bf16 %v1464_v24, %v1463_v20  ;;  %v5968_v20 = vpack.c.bf16 %v1581_v5, %v1580_v3  ;;  %v1582_v24 = vld [vmem:[#allocation4 + $0x50] sm:$0xff]  ;;  %v1564_v3 = vld [vmem:[%s6338_s4 + $0x40] sm:$0xff]  ;;  %v1565_v5 = vld [vmem:[%s6338_s4 + $0x48] sm:$0xff] }
 0x34a   :  { %4583 = vmatprep.subr.bf16.mxu0 %v5502_v45 }
 0x34d   :  { %4585 = vmatpush3.bf16.msra.mxu0 %v5502_v45  ;;  %v1465_v45 = vld [vmem:[%s6337_s3 + $0x20] sm:$0xff] }
 0x34e   :  { %4587 = vmatprep.subr.bf16.mxu0 %v5524_v51 }
 0x351   :  { %4589 = vmatpush3.bf16.msra.mxu0 %v5524_v51  ;;  %v1466_v51 = vld [vmem:[%s6337_s3 + $0x28] sm:$0xff] }
 0x352   :  { %4655 = vmatprep.subr.bf16.mxu0 %v5845_v10  ;;  %v5865_v63 = vpack.c.bf16 %v1466_v51, %v1465_v45  ;;  %v1583_v45 = vld [vmem:[#allocation4 + $0x58] sm:$0xff] }
 0x353   :  { %v5983_v51 = vpack.c.bf16 %v1583_v45, %v1582_v24  ;;  %v6056_v24 = vpack.c.bf16 %v1565_v5, %v1564_v3  ;;  %v1566_v45 = vld [vmem:[%s6338_s4 + $0x50] sm:$0xff]  ;;  %v2621_v3 = vld [vmem:[#allocation7 + $0x8] sm:$0xff]  ;;  %v2623_v5 = vld [vmem:[#allocation7 + $0x18] sm:$0xff] }
 0x354   :  { %3712 = vmatmul.mubr.f32.vlgmr.msra.gmra.mrb[10].mxu0 %v5143_v52  ;;  %v6068_v2 = vpack.c.bf16 %v1567_v0, %v1566_v45 }
 0x355   :  { %4657 = vmatpush3.bf16.msra.mxu0 %v5845_v10 }
 0x356   :  { %4659 = vmatprep.subr.bf16.mxu0 %v5855_v36 }
 0x359   :  { %4661 = vmatpush3.bf16.msra.mxu0 %v5855_v36 }
 0x35a   :  { %4663 = vmatprep.subr.bf16.mxu0 %v5865_v63 }
 0x35d   :  { %4665 = vmatpush3.bf16.msra.mxu0 %v5865_v63 }
 0x35e   :  { %4667 = vmatprep.subr.bf16.mxu0 %v5875_v4 }
 0x361   :  { %4669 = vmatpush3.bf16.msra.mxu0 %v5875_v4 }
 0x362   :  { %4671 = vmatprep.subr.bf16.mxu0 %v5885_v22 }
 0x365   :  { %4673 = vmatpush3.bf16.msra.mxu0 %v5885_v22 }
 0x366   :  { %4675 = vmatprep.subr.bf16.mxu0 %v5895_v28 }
 0x369   :  { %4677 = vmatpush3.bf16.msra.mxu0 %v5895_v28 }
 0x36a   :  { %4679 = vmatprep.subr.bf16.mxu0 %v5905_v33 }
 0x36d   :  { %4681 = vmatpush3.bf16.msra.mxu0 %v5905_v33 }
 0x36e   :  { %4683 = vmatprep.subr.bf16.mxu0 %v5915_v39 }
 0x371   :  { %4685 = vmatpush3.bf16.msra.mxu0 %v5915_v39 }
 0x372   :  { %4751 = vmatprep.subr.bf16.mxu0 %v5845_v10 }
 0x407   :  { %v3678_v40 = vpop.f32.mrb[8].mxu0 }
 0x408   :  { %v1169_v43 = vadd.f32 %v3678_v40, %v5738_v26  ;;  %v1159_v44 = vpop.f32.mrb[9].mxu0  ;;  %v253_v40 = vadd.f32 %v5679_v56, %v5717_v12  ;;  %v1559_v12 = vld [vmem:[%s6338_s4 + $0x18] sm:$0xff] }
 0x409   :  { %v1168_v46 = vadd.f32 %v5738_v26, %v1159_v44 }
 0x40b   :  { %5144 = vtanh.f32 %v1168_v46 }
 0x40c   :  { %5146 = vtanh.f32 %v1169_v43 }
 0x415   :  { %v5922_v54 = vpop.eup %5144 }
 0x416   :  { %v5924_v58 = vpop.eup %5146  ;;  %3746 = vmatprep.mubr.f32.mxu1 %v5922_v54 }
 0x417   :  { %3747 = vmatmul.mubr.f32.vlgmr.msra.gmra.mrb[20].mxu1 %v5924_v58 }
 0x418   :  { %4625 = vmatpush3.bf16.msra.mxu1 %v5447_v29  ;;  %v243_v29 = vadd.f32 %v5679_v56, %v5674_v55  ;;  %v1574_v55 = vld [vmem:[#allocation4 + $0x10] sm:$0xff] }
 0x419   :  { %4627 = vmatprep.subr.bf16.mxu1 %v5464_v34  ;;  %v5950_v59 = vpack.c.bf16 %v1575_v57, %v1574_v55  ;;  %v1560_v57 = vld [vmem:[%s6338_s4 + $0x20] sm:$0xff] }
 0x41c   :  { %4629 = vmatpush3.bf16.msra.mxu1 %v5464_v34 }
 0x41d   :  { %4631 = vmatprep.subr.bf16.mxu1 %v5487_v41 }
 0x420   :  { %4633 = vmatpush3.bf16.msra.mxu1 %v5487_v41  ;;  %v1572_v41 = vld [vmem:[#allocation4] sm:$0xff] }
 0x421   :  { %4635 = vmatprep.subr.bf16.mxu1 %v5515_v49 }
 0x424   :  { %4637 = vmatpush3.bf16.msra.mxu1 %v5515_v49  ;;  %v1573_v49 = vld [vmem:[#allocation4 + $0x8] sm:$0xff] }
 0x425   :  { %4639 = vmatprep.subr.bf16.mxu1 %v5605_v23  ;;  %v5946_v53 = vpack.c.bf16 %v1573_v49, %v1572_v41  ;;  %v6020_v49 = vpack.c.bf16 %v1559_v12, %v1558_v11 }
 0x427   :  { %v3713_v1 = vpop.f32.mrb[10].mxu0 }
 0x428   :  { %v1268_v6 = vadd.f32 %v3713_v1, %v248_v62  ;;  %v1258_v9 = vpop.f32.mrb[11].mxu0  ;;  %4641 = vmatpush3.bf16.msra.mxu1 %v5605_v23 }
 0x429   :  { %v1267_v34 = vadd.f32 %v1258_v9, %v243_v29  ;;  %4643 = vmatprep.subr.bf16.mxu1 %v5622_v30 }
 0x42b   :  { %5148 = vtanh.f32 %v1267_v34 }
 0x42c   :  { %5150 = vtanh.f32 %v1268_v6  ;;  %4645 = vmatpush3.bf16.msra.mxu1 %v5622_v30 }
 0x42d   :  { %4647 = vmatprep.subr.bf16.mxu1 %v5643_v38 }
 0x430   :  { %4649 = vmatpush3.bf16.msra.mxu1 %v5643_v38  ;;  %v5956_v38 = vpack.c.bf16 %v1577_v60, %v1576_v13  ;;  %v1562_v60 = vld [vmem:[%s6338_s4 + $0x30] sm:$0xff] }
 0x431   :  { %4651 = vmatprep.subr.bf16.mxu1 %v5652_v42 }
 0x434   :  { %4653 = vmatpush3.bf16.msra.mxu1 %v5652_v42  ;;  %v1578_v42 = vld [vmem:[#allocation4 + $0x30] sm:$0xff] }
 0x435   :  { %v5149_v23 = vpop.eup %5148  ;;  %4687 = vmatprep.subr.bf16.mxu1 %v5946_v53  ;;  %v5962_v52 = vpack.c.bf16 %v1579_v50, %v1578_v42  ;;  %v1563_v42 = vld [vmem:[%s6338_s4 + $0x38] sm:$0xff] }
 0x436   :  { %v5151_v30 = vpop.eup %5150  ;;  %3781 = vmatprep.mubr.f32.mxu1 %v5149_v23  ;;  %3816 = vmatprep.mubr.f32.mxu0 %v5149_v23  ;;  %v1561_v23 = vld [vmem:[%s6338_s4 + $0x28] sm:$0xff]  ;;  %v6044_v50 = vpack.c.bf16 %v1563_v42, %v1562_v60 }
 0x437   :  { %3782 = vmatmul.mubr.f32.vlgmr.msra.gmra.mrb[20].mxu1 %v5151_v30  ;;  %3817 = vmatmul.mubr.f32.vlgmr.msra.gmra.mrb[12].mxu0 %v5151_v30  ;;  %v6032_v13 = vpack.c.bf16 %v1561_v23, %v1560_v57 }
 0x438   :  { %4689 = vmatpush3.bf16.msra.mxu1 %v5946_v53  ;;  %4753 = vmatpush3.bf16.msra.mxu0 %v5845_v10 }
 0x439   :  { %4691 = vmatprep.subr.bf16.mxu1 %v5950_v59  ;;  %4755 = vmatprep.subr.bf16.mxu0 %v5855_v36 }
 0x43c   :  { %4693 = vmatpush3.bf16.msra.mxu1 %v5950_v59  ;;  %4757 = vmatpush3.bf16.msra.mxu0 %v5855_v36 }
 0x43d   :  { %4695 = vmatprep.subr.bf16.mxu1 %v5956_v38  ;;  %4759 = vmatprep.subr.bf16.mxu0 %v5865_v63 }
 0x440   :  { %4697 = vmatpush3.bf16.msra.mxu1 %v5956_v38  ;;  %4761 = vmatpush3.bf16.msra.mxu0 %v5865_v63 }
 0x441   :  { %4699 = vmatprep.subr.bf16.mxu1 %v5962_v52  ;;  %4763 = vmatprep.subr.bf16.mxu0 %v5875_v4 }
 0x444   :  { %4701 = vmatpush3.bf16.msra.mxu1 %v5962_v52  ;;  %4765 = vmatpush3.bf16.msra.mxu0 %v5875_v4 }
 0x445   :  { %4703 = vmatprep.subr.bf16.mxu1 %v5968_v20  ;;  %4767 = vmatprep.subr.bf16.mxu0 %v5885_v22 }
 0x448   :  { %4705 = vmatpush3.bf16.msra.mxu1 %v5968_v20  ;;  %4769 = vmatpush3.bf16.msra.mxu0 %v5885_v22 }
 0x449   :  { %4771 = vmatprep.subr.bf16.mxu0 %v5895_v28  ;;  %4707 = vmatprep.subr.bf16.mxu1 %v5983_v51 }
 0x44c   :  { %4773 = vmatpush3.bf16.msra.mxu0 %v5895_v28  ;;  %4709 = vmatpush3.bf16.msra.mxu1 %v5983_v51 }
 0x44d   :  { %4775 = vmatprep.subr.bf16.mxu0 %v5905_v33  ;;  %4711 = vmatprep.subr.bf16.mxu1 %v5987_v8 }
 0x450   :  { %4777 = vmatpush3.bf16.msra.mxu0 %v5905_v33  ;;  %4713 = vmatpush3.bf16.msra.mxu1 %v5987_v8 }
 0x451   :  { %4779 = vmatprep.subr.bf16.mxu0 %v5915_v39  ;;  %4715 = vmatprep.subr.bf16.mxu1 %v5989_v27 }
 0x454   :  { %4781 = vmatpush3.bf16.msra.mxu0 %v5915_v39  ;;  %4717 = vmatpush3.bf16.msra.mxu1 %v5989_v27 }
 0x455   :  { %4847 = vmatprep.subr.bf16.mxu0 %v5845_v10  ;;  %4719 = vmatprep.subr.bf16.mxu1 %v6001_v35 }
 0x50a   :  { %v3783_v43 = vpop.f32.mrb[20].mxu1  ;;  %v3818_v44 = vpop.f32.mrb[12].mxu0 }
 0x50b   :  { %v1454_v46 = vadd.f32 %v3783_v43, %v5738_v26  ;;  %v1553_v62 = vadd.f32 %v3818_v44, %v258_v37  ;;  %v1444_v29 = vpop.f32.mrb[21].mxu1  ;;  %v1543_v1 = vpop.f32.mrb[13].mxu0  ;;  %v1571_v37 = vld [vmem:[%s6338_s4 + $0x78] sm:$0xff]  ;;  %v268_v43 = vadd.f32 %v5719_v14, %v5679_v56  ;;  %v263_v44 = vadd.f32 %v5679_v56, %v5721_v15 }
 0x50c   :  { %v1453_v6 = vadd.f32 %v5738_v26, %v1444_v29  ;;  %v1552_v9 = vadd.f32 %v1543_v1, %v253_v40  ;;  %v6092_v40 = vpack.c.bf16 %v1571_v37, %v1570_v32  ;;  %v2627_v32 = vld [vmem:[#allocation7 + $0x38] sm:$0xff] }
 0x50d   :  { %5152 = vtanh.f32 %v1454_v46 }
 0x50e   :  { %5154 = vtanh.f32 %v1453_v6 }
 0x50f   :  { %5156 = vtanh.f32 %v1552_v9 }
 0x510   :  { %5158 = vtanh.f32 %v1553_v62 }
 0x517   :  { %v6016_v34 = vpop.eup %5152 }
 0x518   :  { %v6018_v41 = vpop.eup %5154 }
 0x519   :  { %v5157_v55 = vpop.eup %5156  ;;  %3851 = vmatprep.mubr.f32.mxu1 %v6018_v41 }
 0x51a   :  { %v5159_v30 = vpop.eup %5158  ;;  %3921 = vmatprep.mubr.f32.mxu0 %v5157_v55  ;;  %3852 = vmatmul.mubr.f32.vlgmr.msra.gmra.mrb[22].mxu1 %v6016_v34 }
 0x51b   :  { %4721 = vmatpush3.bf16.msra.mxu1 %v6001_v35  ;;  %3922 = vmatmul.mubr.f32.vlgmr.msra.gmra.mrb[14].mxu0 %v5159_v30 }
 0x51c   :  { %3886 = vmatprep.mubr.f32.mxu1 %v5157_v55  ;;  %4723 = vmatprep.subr.bf16.mxu1 %v6020_v49 }
 0x51d   :  { %4849 = vmatpush3.bf16.msra.mxu0 %v5845_v10 }
 0x51e   :  { %4851 = vmatprep.subr.bf16.mxu0 %v5855_v36 }
 0x51f   :  { %4725 = vmatpush3.bf16.msra.mxu1 %v6020_v49 }
 0x520   :  { %4727 = vmatprep.subr.bf16.mxu1 %v6032_v13 }
 0x521   :  { %4853 = vmatpush3.bf16.msra.mxu0 %v5855_v36 }
 0x522   :  { %4855 = vmatprep.subr.bf16.mxu0 %v5865_v63 }
 0x523   :  { %4729 = vmatpush3.bf16.msra.mxu1 %v6032_v13 }
 0x524   :  { %4731 = vmatprep.subr.bf16.mxu1 %v6044_v50 }
 0x525   :  { %4857 = vmatpush3.bf16.msra.mxu0 %v5865_v63 }
 0x526   :  { %4859 = vmatprep.subr.bf16.mxu0 %v5875_v4 }
 0x527   :  { %4733 = vmatpush3.bf16.msra.mxu1 %v6044_v50 }
 0x528   :  { %4735 = vmatprep.subr.bf16.mxu1 %v6056_v24 }
 0x529   :  { %4861 = vmatpush3.bf16.msra.mxu0 %v5875_v4 }
 0x52a   :  { %4863 = vmatprep.subr.bf16.mxu0 %v5885_v22 }
 0x52b   :  { %4737 = vmatpush3.bf16.msra.mxu1 %v6056_v24 }
 0x52c   :  { %4739 = vmatprep.subr.bf16.mxu1 %v6068_v2 }
 0x52d   :  { %4865 = vmatpush3.bf16.msra.mxu0 %v5885_v22 }
 0x52e   :  { %4867 = vmatprep.subr.bf16.mxu0 %v5895_v28 }
 0x52f   :  { %4741 = vmatpush3.bf16.msra.mxu1 %v6068_v2 }
 0x530   :  { %4743 = vmatprep.subr.bf16.mxu1 %v6080_v31 }
 0x531   :  { %4869 = vmatpush3.bf16.msra.mxu0 %v5895_v28 }
 0x532   :  { %4871 = vmatprep.subr.bf16.mxu0 %v5905_v33 }
 0x533   :  { %4745 = vmatpush3.bf16.msra.mxu1 %v6080_v31 }
 0x534   :  { %4747 = vmatprep.subr.bf16.mxu1 %v6092_v40 }
 0x535   :  { %4873 = vmatpush3.bf16.msra.mxu0 %v5905_v33 }
 0x536   :  { %4875 = vmatprep.subr.bf16.mxu0 %v5915_v39 }
 0x537   :  { %4749 = vmatpush3.bf16.msra.mxu1 %v6092_v40 }
 0x538   :  { %4783 = vmatprep.subr.bf16.mxu1 %v5946_v53 }
 0x539   :  { %4877 = vmatpush3.bf16.msra.mxu0 %v5915_v39 }
 0x53a   :  { %3887 = vmatmul.mubr.f32.vlgmr.msra.gmra.mrb[22].mxu1 %v5159_v30  ;;  %4879 = vmatprep.subr.bf16.mxu0 %v5946_v53 }
 0x53b   :  { %4785 = vmatpush3.bf16.msra.mxu1 %v5946_v53 }
 0x53c   :  { %4787 = vmatprep.subr.bf16.mxu1 %v5950_v59 }
 0x53f   :  { %4789 = vmatpush3.bf16.msra.mxu1 %v5950_v59 }
 0x540   :  { %4791 = vmatprep.subr.bf16.mxu1 %v5956_v38 }
 0x543   :  { %4793 = vmatpush3.bf16.msra.mxu1 %v5956_v38 }
 0x544   :  { %4795 = vmatprep.subr.bf16.mxu1 %v5962_v52 }
 0x547   :  { %4797 = vmatpush3.bf16.msra.mxu1 %v5962_v52 }
 0x548   :  { %4799 = vmatprep.subr.bf16.mxu1 %v5968_v20 }
 0x54b   :  { %4801 = vmatpush3.bf16.msra.mxu1 %v5968_v20 }
 0x54c   :  { %4803 = vmatprep.subr.bf16.mxu1 %v5983_v51 }
 0x54f   :  { %4805 = vmatpush3.bf16.msra.mxu1 %v5983_v51 }
 0x550   :  { %4807 = vmatprep.subr.bf16.mxu1 %v5987_v8 }
 0x553   :  { %4809 = vmatpush3.bf16.msra.mxu1 %v5987_v8 }
 0x554   :  { %4811 = vmatprep.subr.bf16.mxu1 %v5989_v27 }
 0x557   :  { %4813 = vmatpush3.bf16.msra.mxu1 %v5989_v27 }
 0x558   :  { %4815 = vmatprep.subr.bf16.mxu1 %v6001_v35 }
 0x5ee   :  { %v3923_v46 = vpop.f32.mrb[14].mxu0 }
 0x5ef   :  { %v1838_v62 = vadd.f32 %v3923_v46, %v268_v43  ;;  %v1828_v29 = vpop.f32.mrb[15].mxu0  ;;  %v2629_v43 = vld [vmem:[#allocation7 + $0x48] sm:$0xff]  ;;  %v2630_v46 = vld [vmem:[#allocation7 + $0x50] sm:$0xff] }
 0x5f0   :  { %v1837_v1 = vadd.f32 %v1828_v29, %v263_v44 }
 0x5f2   :  { %5160 = vtanh.f32 %v1837_v1  ;;  %v2632_v1 = vld [vmem:[#allocation7 + $0x60] sm:$0xff] }
 0x5f3   :  { %5162 = vtanh.f32 %v1838_v62  ;;  %v2631_v62 = vld [vmem:[#allocation7 + $0x58] sm:$0xff] }
 0x5f4   :  { %v5058_v29 = vpack.c.bf16 %v2631_v62, %v2630_v46 }
 0x5fc   :  { %v5161_v6 = vpop.eup %5160 }
 0x5fd   :  { %v5163_v9 = vpop.eup %5162  ;;  %4026 = vmatprep.mubr.f32.mxu0 %v5161_v6 }
 0x5fe   :  { %4027 = vmatmul.mubr.f32.vlgmr.msra.gmra.mrb[16].mxu0 %v5163_v9 }
 0x5ff   :  { %4881 = vmatpush3.bf16.msra.mxu0 %v5946_v53 }
 0x600   :  { %4883 = vmatprep.subr.bf16.mxu0 %v5950_v59 }
 0x603   :  { %4885 = vmatpush3.bf16.msra.mxu0 %v5950_v59 }
 0x604   :  { %4887 = vmatprep.subr.bf16.mxu0 %v5956_v38 }
 0x607   :  { %4889 = vmatpush3.bf16.msra.mxu0 %v5956_v38 }
 0x608   :  { %4891 = vmatprep.subr.bf16.mxu0 %v5962_v52 }
 0x60b   :  { %4893 = vmatpush3.bf16.msra.mxu0 %v5962_v52 }
 0x60c   :  { %4895 = vmatprep.subr.bf16.mxu0 %v5968_v20 }
 0x60d   :  { %v3888_v14 = vpop.f32.mrb[22].mxu1 }
 0x60e   :  { %v1739_v15 = vadd.f32 %v3888_v14, %v5738_v26  ;;  %v1729_v11 = vpop.f32.mrb[23].mxu1  ;;  %v2635_v14 = vld [vmem:[#allocation7 + $0x78] sm:$0xff] }
 0x60f   :  { %v1738_v12 = vadd.f32 %v5738_v26, %v1729_v11  ;;  %4897 = vmatpush3.bf16.msra.mxu0 %v5968_v20  ;;  %v2847_v11 = vld [vmem:[%s6343_s9] ss:$0 sm:$0xff] }
 0x610   :  { %4899 = vmatprep.subr.bf16.mxu0 %v5983_v51 }
 0x611   :  { %5164 = vtanh.f32 %v1738_v12 }
 0x612   :  { %5166 = vtanh.f32 %v1739_v15 }
 0x613   :  { %4901 = vmatpush3.bf16.msra.mxu0 %v5983_v51 }
 0x614   :  { %4903 = vmatprep.subr.bf16.mxu0 %v5987_v8 }
 0x617   :  { %4905 = vmatpush3.bf16.msra.mxu0 %v5987_v8 }
 0x618   :  { %4907 = vmatprep.subr.bf16.mxu0 %v5989_v27 }
 0x61b   :  { %v6140_v55 = vpop.eup %5164  ;;  %4909 = vmatpush3.bf16.msra.mxu0 %v5989_v27 }
 0x61c   :  { %v6143_v57 = vpop.eup %5166  ;;  %3956 = vmatprep.mubr.f32.mxu1 %v6140_v55  ;;  %4911 = vmatprep.subr.bf16.mxu0 %v6001_v35 }
 0x61d   :  { %3957 = vmatmul.mubr.f32.vlgmr.msra.gmra.mrb[24].mxu1 %v6143_v57 }
 0x61e   :  { %4817 = vmatpush3.bf16.msra.mxu1 %v6001_v35  ;;  %3991 = vmatprep.mubr.f32.mxu1 %v5161_v6  ;;  %v2633_v6 = vld [vmem:[#allocation7 + $0x68] sm:$0xff] }
 0x61f   :  { %4819 = vmatprep.subr.bf16.mxu1 %v6020_v49 }
 0x622   :  { %4821 = vmatpush3.bf16.msra.mxu1 %v6020_v49 }
 0x623   :  { %4823 = vmatprep.subr.bf16.mxu1 %v6032_v13 }
 0x626   :  { %4825 = vmatpush3.bf16.msra.mxu1 %v6032_v13 }
 0x627   :  { %4827 = vmatprep.subr.bf16.mxu1 %v6044_v50 }
 0x62a   :  { %4829 = vmatpush3.bf16.msra.mxu1 %v6044_v50 }
 0x62b   :  { %4831 = vmatprep.subr.bf16.mxu1 %v6056_v24 }
 0x62e   :  { %4833 = vmatpush3.bf16.msra.mxu1 %v6056_v24 }
 0x62f   :  { %4835 = vmatprep.subr.bf16.mxu1 %v6068_v2 }
 0x632   :  { %4837 = vmatpush3.bf16.msra.mxu1 %v6068_v2 }
 0x633   :  { %4839 = vmatprep.subr.bf16.mxu1 %v6080_v31 }
 0x636   :  { %4841 = vmatpush3.bf16.msra.mxu1 %v6080_v31 }
 0x637   :  { %4843 = vmatprep.subr.bf16.mxu1 %v6092_v40 }
 0x63a   :  { %4845 = vmatpush3.bf16.msra.mxu1 %v6092_v40 }
 0x63b   :  { %4975 = vmatprep.subr.bf16.mxu1 %v5946_v53 }
 0x63d   :  { %3992 = vmatmul.mubr.f32.vlgmr.msra.gmra.mrb[24].mxu1 %v5163_v9  ;;  %v2634_v9 = vld [vmem:[#allocation7 + $0x70] sm:$0xff] }
 0x63e   :  { %4977 = vmatpush3.bf16.msra.mxu1 %v5946_v53  ;;  %v278_v53 = vadd.f32 %v5723_v17, %v5679_v56  ;;  %v5066_v15 = vpack.c.bf16 %v2635_v14, %v2634_v9 }
 0x63f   :  { %4979 = vmatprep.subr.bf16.mxu1 %v5950_v59 }
 0x642   :  { %4981 = vmatpush3.bf16.msra.mxu1 %v5950_v59  ;;  %v273_v59 = vadd.f32 %v5679_v56, %v5725_v18 }
 0x643   :  { %4983 = vmatprep.subr.bf16.mxu1 %v5956_v38 }
 0x646   :  { %4985 = vmatpush3.bf16.msra.mxu1 %v5956_v38 }
 0x647   :  { %4987 = vmatprep.subr.bf16.mxu1 %v5962_v52 }
 0x64a   :  { %4989 = vmatpush3.bf16.msra.mxu1 %v5962_v52 }
 0x64b   :  { %4991 = vmatprep.subr.bf16.mxu1 %v5968_v20 }
 0x64e   :  { %4993 = vmatpush3.bf16.msra.mxu1 %v5968_v20 }
 0x64f   :  { %4995 = vmatprep.subr.bf16.mxu1 %v5983_v51 }
 0x652   :  { %4997 = vmatpush3.bf16.msra.mxu1 %v5983_v51 }
 0x653   :  { %4999 = vmatprep.subr.bf16.mxu1 %v5987_v8 }
 0x656   :  { %5001 = vmatpush3.bf16.msra.mxu1 %v5987_v8 }
 0x657   :  { %5003 = vmatprep.subr.bf16.mxu1 %v5989_v27 }
 0x65a   :  { %5005 = vmatpush3.bf16.msra.mxu1 %v5989_v27 }
 0x65b   :  { %5007 = vmatprep.subr.bf16.mxu1 %v6001_v35 }
 0x6d1   :  { %v4028_v38 = vpop.f32.mrb[16].mxu0 }
 0x6d2   :  { %v2123_v52 = vadd.f32 %v4028_v38, %v278_v53  ;;  %v2113_v20 = vpop.f32.mrb[17].mxu0 }
 0x6d3   :  { %v2122_v51 = vadd.f32 %v2113_v20, %v273_v59 }
 0x710   :  { %v3993_v23 = vpop.f32.mrb[24].mxu1 }
 0x711   :  { %v2024_v30 = vadd.f32 %v3993_v23, %v5738_v26  ;;  %v2014_v8 = vpop.f32.mrb[25].mxu1 }
 0x712   :  { %v2023_v60 = vadd.f32 %v5738_v26, %v2014_v8 }
 0x714   :  { %5168 = vtanh.f32 %v2023_v60 }
 0x715   :  { %5170 = vtanh.f32 %v2024_v30 }
 0x716   :  { %5172 = vtanh.f32 %v2122_v51 }
 0x717   :  { %5174 = vtanh.f32 %v2123_v52 }
 0x71e   :  { %v6186_v27 = vpop.eup %5168 }
 0x71f   :  { %v6188_v42 = vpop.eup %5170  ;;  %4061 = vmatprep.mubr.f32.mxu0 %v6186_v27 }
 0x720   :  { %v5173_v56 = vpop.eup %5172  ;;  %4062 = vmatmul.mubr.f32.vlgmr.msra.gmra.mrb[18].mxu0 %v6188_v42 }
 0x721   :  { %4913 = vmatpush3.bf16.msra.mxu0 %v6001_v35  ;;  %4096 = vmatprep.mubr.f32.mxu0 %v5173_v56  ;;  %v5175_v17 = vpop.eup %5174 }
 0x722   :  { %4915 = vmatprep.subr.bf16.mxu0 %v6020_v49 }
 0x725   :  { %4917 = vmatpush3.bf16.msra.mxu0 %v6020_v49 }
 0x726   :  { %4919 = vmatprep.subr.bf16.mxu0 %v6032_v13 }
 0x729   :  { %4921 = vmatpush3.bf16.msra.mxu0 %v6032_v13 }
 0x72a   :  { %4923 = vmatprep.subr.bf16.mxu0 %v6044_v50 }
 0x72d   :  { %4925 = vmatpush3.bf16.msra.mxu0 %v6044_v50 }
 0x72e   :  { %4927 = vmatprep.subr.bf16.mxu0 %v6056_v24 }
 0x731   :  { %4929 = vmatpush3.bf16.msra.mxu0 %v6056_v24 }
 0x732   :  { %4931 = vmatprep.subr.bf16.mxu0 %v6068_v2 }
 0x735   :  { %4933 = vmatpush3.bf16.msra.mxu0 %v6068_v2 }
 0x736   :  { %4935 = vmatprep.subr.bf16.mxu0 %v6080_v31 }
 0x739   :  { %4937 = vmatpush3.bf16.msra.mxu0 %v6080_v31 }
 0x73a   :  { %4939 = vmatprep.subr.bf16.mxu0 %v6092_v40 }
 0x73d   :  { %4941 = vmatpush3.bf16.msra.mxu0 %v6092_v40 }
 0x73e   :  { %4943 = vmatprep.subr.bf16.mxu0 %v5845_v10 }
 0x740   :  { %4097 = vmatmul.mubr.f32.vlgmr.msra.gmra.mrb[18].mxu0 %v5175_v17 }
 0x741   :  { %4945 = vmatpush3.bf16.msra.mxu0 %v5845_v10  ;;  %4131 = vmatprep.mubr.f32.mxu0 %v5173_v56 }
 0x742   :  { %4947 = vmatprep.subr.bf16.mxu0 %v5855_v36 }
 0x745   :  { %4949 = vmatpush3.bf16.msra.mxu0 %v5855_v36 }
 0x746   :  { %4951 = vmatprep.subr.bf16.mxu0 %v5865_v63 }
 0x749   :  { %4953 = vmatpush3.bf16.msra.mxu0 %v5865_v63 }
 0x74a   :  { %4955 = vmatprep.subr.bf16.mxu0 %v5875_v4 }
 0x74d   :  { %4957 = vmatpush3.bf16.msra.mxu0 %v5875_v4 }
 0x74e   :  { %4959 = vmatprep.subr.bf16.mxu0 %v5885_v22 }
 0x751   :  { %4961 = vmatpush3.bf16.msra.mxu0 %v5885_v22 }
 0x752   :  { %4963 = vmatprep.subr.bf16.mxu0 %v5895_v28 }
 0x755   :  { %4965 = vmatpush3.bf16.msra.mxu0 %v5895_v28 }
 0x756   :  { %4967 = vmatprep.subr.bf16.mxu0 %v5905_v33 }
 0x759   :  { %4969 = vmatpush3.bf16.msra.mxu0 %v5905_v33 }
 0x75a   :  { %4971 = vmatprep.subr.bf16.mxu0 %v5915_v39 }
 0x75d   :  { %4973 = vmatpush3.bf16.msra.mxu0 %v5915_v39 }
 0x760   :  { %4132 = vmatmul.mubr.f32.vlgmr.msra.gmra.mrb[20].mxu0 %v5175_v17 }
 0x813   :  { %v4098_v18 = vpop.f32.mrb[18].mxu0 }
 0x814   :  { %v2309_v10 = vadd.f32 %v4098_v18, %v5738_v26  ;;  %v2299_v36 = vpop.f32.mrb[19].mxu0 }
 0x815   :  { %v2308_v63 = vadd.f32 %v5738_v26, %v2299_v36  ;;  %v5188_v26 = vld [vmem:[%s6340_s6] ss:$0 sm:$0xff] }
 0x816   :  { %v288_v28 = vadd.f32 %v5188_v26, %v5727_v19  ;;  %v283_v33 = vadd.f32 %v5188_v26, %v5729_v21  ;;  %v2622_v21 = vld [vmem:[#allocation7 + $0x10] sm:$0xff] }
 0x817   :  { %5176 = vtanh.f32 %v2308_v63  ;;  %v5042_v0 = vpack.c.bf16 %v2623_v5, %v2622_v21 }
 0x818   :  { %5178 = vtanh.f32 %v2309_v10 }
 0x821   :  { %v6225_v4 = vpop.eup %5176 }
 0x822   :  { %v6227_v22 = vpop.eup %5178  ;;  %4166 = vmatprep.mubr.f32.mxu1 %v6225_v4 }
 0x823   :  { %4167 = vmatmul.mubr.f32.vlgmr.msra.gmra.mrb[26].mxu1 %v6227_v22 }
 0x824   :  { %5009 = vmatpush3.bf16.msra.mxu1 %v6001_v35 }
 0x825   :  { %5011 = vmatprep.subr.bf16.mxu1 %v6020_v49 }
 0x828   :  { %5013 = vmatpush3.bf16.msra.mxu1 %v6020_v49 }
 0x829   :  { %5015 = vmatprep.subr.bf16.mxu1 %v6032_v13 }
 0x82c   :  { %5017 = vmatpush3.bf16.msra.mxu1 %v6032_v13 }
 0x82d   :  { %5019 = vmatprep.subr.bf16.mxu1 %v6044_v50 }
 0x830   :  { %5021 = vmatpush3.bf16.msra.mxu1 %v6044_v50  ;;  %v2620_v50 = vld [vmem:[#allocation7] sm:$0xff] }
 0x831   :  { %5023 = vmatprep.subr.bf16.mxu1 %v6056_v24  ;;  %v5038_v19 = vpack.c.bf16 %v2621_v3, %v2620_v50 }
 0x833   :  { %v4133_v39 = vpop.f32.mrb[20].mxu0 }
 0x834   :  { %v2408_v35 = vadd.f32 %v4133_v39, %v288_v28  ;;  %5025 = vmatpush3.bf16.msra.mxu1 %v6056_v24  ;;  %v2398_v49 = vpop.f32.mrb[21].mxu0 }
 0x835   :  { %v2407_v13 = vadd.f32 %v2398_v49, %v283_v33  ;;  %5027 = vmatprep.subr.bf16.mxu1 %v6068_v2 }
 0x836   :  { %5180 = vtanh.f32 %v2408_v35 }
 0x837   :  { %5182 = vtanh.f32 %v2407_v13 }
 0x838   :  { %5029 = vmatpush3.bf16.msra.mxu1 %v6068_v2  ;;  %v2624_v2 = vld [vmem:[#allocation7 + $0x20] sm:$0xff] }
 0x839   :  { %5031 = vmatprep.subr.bf16.mxu1 %v6080_v31  ;;  %v5046_v25 = vpack.c.bf16 %v2625_v7, %v2624_v2 }
 0x83c   :  { %5033 = vmatpush3.bf16.msra.mxu1 %v6080_v31  ;;  %v2626_v31 = vld [vmem:[#allocation7 + $0x30] sm:$0xff] }
 0x83d   :  { %5035 = vmatprep.subr.bf16.mxu1 %v6092_v40  ;;  %v5050_v37 = vpack.c.bf16 %v2627_v32, %v2626_v31 }
 0x840   :  { %v5181_v24 = vpop.eup %5180  ;;  %5037 = vmatpush3.bf16.msra.mxu1 %v6092_v40  ;;  %v2628_v40 = vld [vmem:[#allocation7 + $0x40] sm:$0xff] }
 0x841   :  { %v5183_v45 = vpop.eup %5182  ;;  %2600 = vst [vmem:[#allocation9 + $0x8] sm:$0xff] %v5181_v24  ;;  %5039 = vmatprep.subr.bf16.mxu1 %v5038_v19  ;;  %v5054_v44 = vpack.c.bf16 %v2629_v43, %v2628_v40 }
 0x842   :  { %2599 = vst [vmem:[#allocation9] sm:$0xff] %v5183_v45  ;;  %4201 = vmatprep.mubr.f32.mxu1 %v5183_v45 }
 0x843   :  { %4202 = vmatmul.mubr.f32.vlgmr.msra.gmra.mrb[26].mxu1 %v5181_v24 }
 0x844   :  { %5041 = vmatpush3.bf16.msra.mxu1 %v5038_v19  ;;  %4236 = vmatprep.mubr.f32.mxu1 %v5742_v47  ;;  %v5062_v47 = vpack.c.bf16 %v2633_v6, %v2632_v1 }
 0x845   :  { %5043 = vmatprep.subr.bf16.mxu1 %v5042_v0 }
 0x848   :  { %5045 = vmatpush3.bf16.msra.mxu1 %v5042_v0 }
 0x849   :  { %5047 = vmatprep.subr.bf16.mxu1 %v5046_v25 }
 0x84c   :  { %5049 = vmatpush3.bf16.msra.mxu1 %v5046_v25 }
 0x84d   :  { %5051 = vmatprep.subr.bf16.mxu1 %v5050_v37 }
 0x850   :  { %5053 = vmatpush3.bf16.msra.mxu1 %v5050_v37 }
 0x851   :  { %5055 = vmatprep.subr.bf16.mxu1 %v5054_v44 }
 0x854   :  { %5057 = vmatpush3.bf16.msra.mxu1 %v5054_v44 }
 0x855   :  { %5059 = vmatprep.subr.bf16.mxu1 %v5058_v29 }
 0x858   :  { %5061 = vmatpush3.bf16.msra.mxu1 %v5058_v29 }
 0x859   :  { %5063 = vmatprep.subr.bf16.mxu1 %v5062_v47 }
 0x85c   :  { %5065 = vmatpush3.bf16.msra.mxu1 %v5062_v47 }
 0x85d   :  { %5067 = vmatprep.subr.bf16.mxu1 %v5066_v15 }
 0x860   :  { %5069 = vmatpush3.bf16.msra.mxu1 %v5066_v15 }
 0x863   :  { %4237 = vmatmul.mubr.f32.vlgmr.msra.gmra.mrb[28].mxu1 %v5744_v48 }
 0x864   :  { %4239 = vmatprep.mubr.f32.mxu1 %v5802_v16  ;;  %v5189_v16 = vld [vmem:[%s6341_s7] ss:$0 sm:$0xff] }
 0x867   :  { %4240 = vmatmul.mubr.f32.gmra.mrb[30].mxu1 %v5804_v61 }
 0x868   :  { %4242 = vmatprep.mubr.f32.mxu1 %v5922_v54 }
 0x86b   :  { %4243 = vmatmul.mubr.f32.gmra.mrb[32].mxu1 %v5924_v58 }
 0x86c   :  { %4245 = vmatprep.mubr.f32.mxu1 %v6018_v41 }
 0x86f   :  { %4246 = vmatmul.mubr.f32.gmra.mrb[34].mxu1 %v6016_v34 }
 0x870   :  { %4248 = vmatprep.mubr.f32.mxu1 %v6140_v55 }
 0x873   :  { %4249 = vmatmul.mubr.f32.gmra.mrb[36].mxu1 %v6143_v57 }
 0x874   :  { %4251 = vmatprep.mubr.f32.mxu1 %v6186_v27 }
 0x877   :  { %4252 = vmatmul.mubr.f32.gmra.mrb[38].mxu1 %v6188_v42 }
 0x878   :  { %4254 = vmatprep.mubr.f32.mxu1 %v6225_v4 }
 0x87b   :  { %4255 = vmatmul.mubr.f32.gmra.mrb[40].mxu1 %v6227_v22 }
 0x916   :  { %v4203_v48 = vpop.f32.mrb[26].mxu1 }
 0x917   :  { %v2594_v61 = vadd.f32 %v5189_v16, %v4203_v48  ;;  %v2584_v54 = vpop.f32.mrb[27].mxu1 }
 0x918   :  { %v2593_v58 = vadd.f32 %v5189_v16, %v2584_v54 }
 0x919   :  { %5184 = vtanh.f32 %v2594_v61 }
 0x91a   :  { %5186 = vtanh.f32 %v2593_v58 }
 0x923   :  { %v5185_v34 = vpop.eup %5184 }
 0x924   :  { %v5187_v41 = vpop.eup %5186  ;;  %2603 = vst [vmem:[#allocation9 + $0x18] sm:$0xff] %v5185_v34 }
 0x925   :  { %2602 = vst [vmem:[#allocation9 + $0x10] sm:$0xff] %v5187_v41  ;;  %4257 = vmatprep.mubr.f32.mxu1 %v5187_v41 }
 0x926   :  { %4258 = vmatmul.mubr.f32.gmra.mrb[42].mxu1 %v5185_v34 }
 0x936   :  { %v4238_v12 = vpop.f32.mrb[28].mxu1 }
 0x937   :  { %v2715_v55 = vadd.f32 %v4238_v12, %v2847_v11  ;;  %v2709_v57 = vpop.f32.mrb[29].mxu1 }
 0x938   :  { %v2710_v53 = vadd.f32 %v2847_v11, %v2709_v57 }
 0x939   :  { %2789 = vst [vmem:[%s6344_s10 + $0x8] sm:$0xff] %v2715_v55 }
 0x93a   :  { %2788 = vst [vmem:[%s6344_s10] sm:$0xff] %v2710_v53  ;;  %v4241_v59 = vpop.f32.mrb[30].mxu1 }
 0x93b   :  { %v2725_v38 = vadd.f32 %v4241_v59, %v2847_v11  ;;  %v2719_v52 = vpop.f32.mrb[31].mxu1 }
 0x93c   :  { %v2720_v20 = vadd.f32 %v2847_v11, %v2719_v52 }
 0x93d   :  { %2791 = vst [vmem:[%s6344_s10 + $0x18] sm:$0xff] %v2725_v38 }
 0x93e   :  { %2790 = vst [vmem:[%s6344_s10 + $0x10] sm:$0xff] %v2720_v20  ;;  %v4244_v51 = vpop.f32.mrb[32].mxu1 }
 0x93f   :  { %v2735_v23 = vadd.f32 %v4244_v51, %v2847_v11  ;;  %v2729_v30 = vpop.f32.mrb[33].mxu1 }
 0x940   :  { %v2730_v8 = vadd.f32 %v2847_v11, %v2729_v30 }
 0x941   :  { %2793 = vst [vmem:[%s6344_s10 + $0x28] sm:$0xff] %v2735_v23 }
 0x942   :  { %2792 = vst [vmem:[%s6344_s10 + $0x20] sm:$0xff] %v2730_v8  ;;  %v4247_v60 = vpop.f32.mrb[34].mxu1 }
 0x943   :  { %v2745_v27 = vadd.f32 %v4247_v60, %v2847_v11  ;;  %v2739_v42 = vpop.f32.mrb[35].mxu1 }
 0x944   :  { %v2740_v56 = vadd.f32 %v2847_v11, %v2739_v42 }
 0x945   :  { %2795 = vst [vmem:[%s6344_s10 + $0x38] sm:$0xff] %v2745_v27 }
 0x946   :  { %2794 = vst [vmem:[%s6344_s10 + $0x30] sm:$0xff] %v2740_v56  ;;  %v4250_v17 = vpop.f32.mrb[36].mxu1 }
 0x947   :  { %v2755_v18 = vadd.f32 %v4250_v17, %v2847_v11  ;;  %v2749_v10 = vpop.f32.mrb[37].mxu1 }
 0x948   :  { %v2750_v36 = vadd.f32 %v2847_v11, %v2749_v10 }
 0x949   :  { %2797 = vst [vmem:[%s6344_s10 + $0x48] sm:$0xff] %v2755_v18 }
 0x94a   :  { %2796 = vst [vmem:[%s6344_s10 + $0x40] sm:$0xff] %v2750_v36  ;;  %v4253_v63 = vpop.f32.mrb[38].mxu1 }
 0x94b   :  { %v2765_v4 = vadd.f32 %v4253_v63, %v2847_v11  ;;  %v2759_v22 = vpop.f32.mrb[39].mxu1 }
 0x94c   :  { %v2760_v26 = vadd.f32 %v2847_v11, %v2759_v22 }
 0x94d   :  { %2799 = vst [vmem:[%s6344_s10 + $0x58] sm:$0xff] %v2765_v4 }
 0x94e   :  { %2798 = vst [vmem:[%s6344_s10 + $0x50] sm:$0xff] %v2760_v26  ;;  %v4256_v28 = vpop.f32.mrb[40].mxu1 }
 0x94f   :  { %v2775_v33 = vadd.f32 %v4256_v28, %v2847_v11  ;;  %v2769_v39 = vpop.f32.mrb[41].mxu1 }
 0x950   :  { %v2770_v35 = vadd.f32 %v2847_v11, %v2769_v39 }
 0x951   :  { %2801 = vst [vmem:[%s6344_s10 + $0x68] sm:$0xff] %v2775_v33 }
 0x952   :  { %2800 = vst [vmem:[%s6344_s10 + $0x60] sm:$0xff] %v2770_v35 }
 0x953   :  { %5245 = shalt.err (!%p5242_p6)
}
 0x954   :  { %s5246_s9 = scalar_lea.hbm %s6345_s11, 512 }
 0x955   :  { %p5247_p7 = scmp.ne.s32.totalorder %s6345_s11, %s5246_s9  ;;  %p5250_p8 = scmp.lt.u32.totalorder %s5246_s9, %s6345_s11 }
 0x957   :  { %p5252_p9 = pnand %p5250_p8, %p5247_p7 }
 0x959   :  { %5255 = shalt.err (!%p5252_p9)
}
 0x95a   :  { %2817 = dma.vmem_to_hbm [thread:$0]  %s2812_s20, 512, %s6345_s11, [#allocation6], %s5263_s27, %s5263_s27, %s5264_s28  }
 0x9f9   :  { %v4259_v49 = vpop.f32.mrb[42].mxu1 }
 0x9fa   :  { %v2785_v13 = vadd.f32 %v4259_v49, %v2847_v11  ;;  %v2779_v50 = vpop.f32.mrb[43].mxu1 }
 0x9fb   :  { %v2780_v3 = vadd.f32 %v2847_v11, %v2779_v50 }
 0x9fc   :  { %2803 = vst [vmem:[%s6344_s10 + $0x78] sm:$0xff] %v2785_v13 }
 0x9fd   :  { %2802 = vst [vmem:[%s6344_s10 + $0x70] sm:$0xff] %v2780_v3 }
 0x9fe   :  { %5260 = dma.done.wait [#allocation6], 512  }
 0x9ff   :  { %5261 = vsyncadd [#allocation6], 4294966784 }
 0xa00   :  { %2823 = vsyncpa [#allocation5], 1 }
 0xa01   :  { %2824 = vsyncpa [#allocation8], 1 }
 0xa02   :  { %2825 = vsyncpa [#allocation6], 1 }

</bundles_post_ra>
